<compile_context>
chip_gen: v5e
topology: v5e:2x2
jax: 0.10.0
libtpu: 0.0.40
codegen_flags: <defaults>
</compile_context>

<pallas_src>
import functools

import jax
import jax.numpy as jnp
from jax import lax
from jax.experimental import pallas as pl
from jax.experimental.pallas import tpu as pltpu

KSIZE = 7
PAD = 3
LANE = 128


def _cbam_kernel(wsa_ref, w1t_ref, w2_ref, x_ref, o_ref,
                 avg_pad_ref, max_pad_ref, ca_ref, *, H, W, margin):
    # wsa_ref : (2*7*7,) f32 SMEM   -- spatial conv weight, OIHW flattened (O=1)
    # w1t_ref : (C, C//ratio) VMEM  -- fc[0].weight transposed
    # w2_ref  : (C, C//ratio) VMEM  -- fc[2].weight
    # x_ref   : (NB, C, H*W) VMEM   -- lane-dense input block
    # o_ref   : (NB, C, H*W) VMEM
    # *_pad_ref: (NB, margin + H*W + margin) f32 VMEM (halo-padded spatial maps)
    # ca_ref  : (C, NB) f32 VMEM    -- per-batch channel-attention vectors
    NB, C, HW = x_ref.shape
    assert H * W == HW
    f32 = jnp.float32

    # ---- hoisted once per grid step -------------------------------------
    w_avg = [[wsa_ref[kh * KSIZE + kw] for kw in range(KSIZE)]
             for kh in range(KSIZE)]
    w_max = [[wsa_ref[KSIZE * KSIZE + kh * KSIZE + kw] for kw in range(KSIZE)]
             for kh in range(KSIZE)]
    w1t = w1t_ref[...].astype(f32)                       # (C, hidden)
    w2 = w2_ref[...].astype(f32)                         # (C, hidden)
    col = lax.broadcasted_iota(jnp.int32, (NB, HW), 1) % W

    # Re-zero only the halo margins (4 small aligned stores per step).
    zmargin = jnp.zeros((NB, margin), f32)
    avg_pad_ref[:, :margin] = zmargin
    avg_pad_ref[:, margin + HW:] = zmargin
    max_pad_ref[:, :margin] = zmargin
    max_pad_ref[:, margin + HW:] = zmargin

    def channel_fc(v):                                   # (C, 1) -> (C, 1)
        h = jnp.sum(w1t * v, axis=0, keepdims=True)      # (1, hidden)
        h = jnp.maximum(h, 0.0)                          # ReLU
        return jnp.sum(w2 * h, axis=1, keepdims=True)    # (C, 1)

    # ---- phase 1: per-batch channel attention + spatial statistics ------
    for b in range(NB):                                  # static unroll
        x = x_ref[b].astype(f32)                         # (C, HW)
        avg_c = jnp.mean(x, axis=1, keepdims=True)       # (C, 1)
        max_c = jnp.max(x, axis=1, keepdims=True)        # (C, 1)
        ca = jax.nn.sigmoid(channel_fc(avg_c) + channel_fc(max_c))  # (C, 1)
        ca_ref[:, b:b + 1] = ca                          # stash for phase 3
        x_ca = x * ca                                    # (C, HW)
        # lane-aligned interior writes (margin % 128 == 0), one sublane row
        avg_pad_ref[b:b + 1, margin:margin + HW] = jnp.mean(
            x_ca, axis=0, keepdims=True)
        max_pad_ref[b:b + 1, margin:margin + HW] = jnp.max(
            x_ca, axis=0, keepdims=True)

    # ---- phase 2: batched 7x7 "same" conv over all NB maps at once ------
    # A (dh, dw) tap of output flat position p reads flat position p + dh*W + dw:
    # vertical overflow lands in the zeroed margins; horizontal overflow aliases
    # the neighbouring row and is masked per dw (mask factors out of the dh sum).
    acc = jnp.zeros((NB, HW), f32)
    for dw in range(-PAD, PAD + 1):
        part = jnp.zeros((NB, HW), f32)
        for dh in range(-PAD, PAD + 1):
            off = margin + dh * W + dw
            a_sh = avg_pad_ref[:, off:off + HW]          # (NB, HW)
            m_sh = max_pad_ref[:, off:off + HW]          # (NB, HW)
            part = part + (w_avg[dh + PAD][dw + PAD] * a_sh
                           + w_max[dh + PAD][dw + PAD] * m_sh)
        if dw > 0:
            part = jnp.where(col < W - dw, part, 0.0)
        elif dw < 0:
            part = jnp.where(col >= -dw, part, 0.0)
        acc = acc + part
    # Reuse the avg-map interior to hold sigmoid(conv) for cheap aligned
    # per-row reads in phase 3.
    avg_pad_ref[:, margin:margin + HW] = jax.nn.sigmoid(acc)

    # ---- phase 3: per-batch gating  out = x * ca * attn ------------------
    for b in range(NB):
        x = x_ref[b].astype(f32)                         # (C, HW)
        ca = ca_ref[:, b:b + 1]                          # (C, 1)
        attn = avg_pad_ref[b:b + 1, margin:margin + HW]  # (1, HW)
        o_ref[b] = ((x * ca) * attn).astype(o_ref.dtype)


def _pick_batch_block(n, bytes_per_item, target_bytes=512 * 1024):
    """Largest divisor of n with block <= target while keeping >= 2 grid steps
    (so both v7x TensorCores get work)."""
    nb = 1
    for cand in range(1, n + 1):
        if n % cand:
            continue
        if cand * bytes_per_item > target_bytes:
            break
        if n // cand < 2 and n > 1:
            break
        nb = cand
    return nb


def cbam(x, w1, w2, wsa, *, batch_block=None):
    """CBAM forward.
    x: (N, C, H, W); w1: (C//ratio, C); w2: (C, C//ratio); wsa: (1, 2, 7, 7)."""
    N, C, H, W = x.shape
    HW = H * W
    hidden = w1.shape[0]
    assert w1.shape == (hidden, C) and w2.shape == (C, hidden)
    assert wsa.shape == (1, 2, KSIZE, KSIZE)

    # Lane-dense layout: fold (H, W) into one trailing axis (256 = 2*128 here).
    x_flat = x.reshape(N, C, HW)
    w1t = jnp.asarray(w1, jnp.float32).T                 # (C, hidden)
    w2f = jnp.asarray(w2, jnp.float32)                   # (C, hidden)
    wsa_flat = jnp.asarray(wsa, jnp.float32).reshape(-1)  # (98,) SMEM scalars

    nb = batch_block if batch_block is not None else _pick_batch_block(
        N, C * HW * x.dtype.itemsize)
    assert N % nb == 0

    # conv halo margin, rounded up to a lane multiple (>= PAD*W + PAD) so the
    # interior scratch writes are 128-aligned.
    margin = ((PAD * W + PAD + LANE - 1) // LANE) * LANE

    kernel = functools.partial(_cbam_kernel, H=H, W=W, margin=margin)
    out_flat = pl.pallas_call(
        kernel,
        out_shape=jax.ShapeDtypeStruct((N, C, HW), x.dtype),
        grid=(N // nb,),
        in_specs=[
            pl.BlockSpec(memory_space=pltpu.MemorySpace.SMEM),   # conv taps
            pl.BlockSpec((C, hidden), lambda b: (0, 0)),         # w1^T
            pl.BlockSpec((C, hidden), lambda b: (0, 0)),         # w2
            pl.BlockSpec((nb, C, HW), lambda b: (b, 0, 0)),      # x (lane-dense)
        ],
        out_specs=pl.BlockSpec((nb, C, HW), lambda b: (b, 0, 0)),
        scratch_shapes=[
            pltpu.VMEM((nb, margin + HW + margin), jnp.float32),  # padded avg map
            pltpu.VMEM((nb, margin + HW + margin), jnp.float32),  # padded max map
            pltpu.VMEM((C, nb), jnp.float32),                     # per-batch ca
        ],
        compiler_params=pltpu.CompilerParams(
            dimension_semantics=("parallel",)),
    )(wsa_flat, w1t, w2f, x_flat)
    return out_flat.reshape(N, C, H, W)


def cbam_ref(x, w1, w2, wsa):
    """Pure-JAX reference mirroring the PyTorch CBAM forward."""
    avg = jnp.mean(x, axis=(2, 3), keepdims=True)        # AdaptiveAvgPool2d(1)
    mx = jnp.max(x, axis=(2, 3), keepdims=True)          # AdaptiveMaxPool2d(1)

    def fc(v):
        h = jnp.einsum("nchw,oc->nohw", v, w1)
        h = jnp.maximum(h, 0.0)
        return jnp.einsum("nohw,co->nchw", h, w2)

    x = jax.nn.sigmoid(fc(avg) + fc(mx)) * x             # channel attention

    avg_s = jnp.mean(x, axis=1, keepdims=True)
    max_s = jnp.max(x, axis=1, keepdims=True)
    cat = jnp.concatenate([avg_s, max_s], axis=1)
    conv = lax.conv_general_dilated(
        cat, wsa, window_strides=(1, 1),
        padding=((PAD, PAD), (PAD, PAD)),
        dimension_numbers=("NCHW", "OIHW", "NCHW"))
    return jax.nn.sigmoid(conv) * x                      # spatial attention


def _run_case(key, N, C, H, W, ratio):
    kx, k1, k2, k3 = jax.random.split(key, 4)
    hidden = C // ratio
    x = jax.random.normal(kx, (N, C, H, W), dtype=jnp.float32)

    # Deterministic Conv2d(..., bias=False) weight inits (Kaiming-uniform-like).
    b1 = 1.0 / (C ** 0.5)
    w1 = jax.random.uniform(k1, (hidden, C), jnp.float32, -b1, b1)
    b2 = 1.0 / (hidden ** 0.5)
    w2 = jax.random.uniform(k2, (C, hidden), jnp.float32, -b2, b2)
    b3 = 1.0 / ((2 * KSIZE * KSIZE) ** 0.5)
    wsa = jax.random.uniform(k3, (1, 2, KSIZE, KSIZE), jnp.float32, -b3, b3)

    out = jax.block_until_ready(cbam(x, w1, w2, wsa))
    ref = cbam_ref(x, w1, w2, wsa)

    assert out.shape == x.shape and out.dtype == x.dtype
    err = jnp.max(jnp.abs(out - ref))
    assert jnp.allclose(out, ref, atol=2e-5, rtol=1e-5), \
        f"mismatch vs JAX reference (N={N}): max abs err {err}"


if __name__ == "__main__":
    key = jax.random.PRNGKey(0)
    k_a, k_b = jax.random.split(key)

    # Primary small case (nb == 1 path).
    _run_case(k_a, N=2, C=32, H=16, W=16, ratio=16)
    # Larger batch to exercise the sublane-batched conv path (nb > 1).
    _run_case(k_b, N=8, C=32, H=16, W=16, ratio=16)

    print("KERNEL_OK")
</pallas_src>

<mosaic_0001>
module attributes {stable_mosaic.version = 11 : i64} {
  func.func @_cbam_kernel(%arg0: i32, %arg1: memref<98xf32, #tpu.memory_space<smem>>, %arg2: memref<32x2xf32, #tpu.memory_space<vmem>>, %arg3: memref<32x2xf32, #tpu.memory_space<vmem>>, %arg4: memref<1x32x256xf32, #tpu.memory_space<vmem>>, %arg5: memref<1x32x256xf32, #tpu.memory_space<vmem>>, %arg6: memref<1x512xf32, #tpu.memory_space<vmem>>, %arg7: memref<1x512xf32, #tpu.memory_space<vmem>>, %arg8: memref<32x1xf32, #tpu.memory_space<vmem>>) attributes {dimension_semantics = [#tpu.dimension_semantics<parallel>], iteration_bounds = array<i64: 2>, scalar_prefetch = 0 : i64, scratch_operands = 3 : i64, tpu.core_type = #tpu.core_type<tc>, window_params = [{transform_indices = @transform_0, window_bounds = array<i64: 98>}, {pipeline_mode = #tpu.pipeline_mode<synchronous>, transform_indices = @transform_1, window_bounds = array<i64: 32, 2>}, {pipeline_mode = #tpu.pipeline_mode<synchronous>, transform_indices = @transform_2, window_bounds = array<i64: 32, 2>}, {transform_indices = @transform_3, window_bounds = array<i64: 1, 32, 256>}, {transform_indices = @transform_4, window_bounds = array<i64: 1, 32, 256>}]} {
    %c0 = arith.constant 0 : index
    %0 = memref.load %arg1[%c0] : memref<98xf32, #tpu.memory_space<smem>>
    %c1 = arith.constant 1 : index
    %1 = memref.load %arg1[%c1] : memref<98xf32, #tpu.memory_space<smem>>
    %c2 = arith.constant 2 : index
    %2 = memref.load %arg1[%c2] : memref<98xf32, #tpu.memory_space<smem>>
    %c3 = arith.constant 3 : index
    %3 = memref.load %arg1[%c3] : memref<98xf32, #tpu.memory_space<smem>>
    %c4 = arith.constant 4 : index
    %4 = memref.load %arg1[%c4] : memref<98xf32, #tpu.memory_space<smem>>
    %c5 = arith.constant 5 : index
    %5 = memref.load %arg1[%c5] : memref<98xf32, #tpu.memory_space<smem>>
    %c6 = arith.constant 6 : index
    %6 = memref.load %arg1[%c6] : memref<98xf32, #tpu.memory_space<smem>>
    %c7 = arith.constant 7 : index
    %7 = memref.load %arg1[%c7] : memref<98xf32, #tpu.memory_space<smem>>
    %c8 = arith.constant 8 : index
    %8 = memref.load %arg1[%c8] : memref<98xf32, #tpu.memory_space<smem>>
    %c9 = arith.constant 9 : index
    %9 = memref.load %arg1[%c9] : memref<98xf32, #tpu.memory_space<smem>>
    %c10 = arith.constant 10 : index
    %10 = memref.load %arg1[%c10] : memref<98xf32, #tpu.memory_space<smem>>
    %c11 = arith.constant 11 : index
    %11 = memref.load %arg1[%c11] : memref<98xf32, #tpu.memory_space<smem>>
    %c12 = arith.constant 12 : index
    %12 = memref.load %arg1[%c12] : memref<98xf32, #tpu.memory_space<smem>>
    %c13 = arith.constant 13 : index
    %13 = memref.load %arg1[%c13] : memref<98xf32, #tpu.memory_space<smem>>
    %c14 = arith.constant 14 : index
    %14 = memref.load %arg1[%c14] : memref<98xf32, #tpu.memory_space<smem>>
    %c15 = arith.constant 15 : index
    %15 = memref.load %arg1[%c15] : memref<98xf32, #tpu.memory_space<smem>>
    %c16 = arith.constant 16 : index
    %16 = memref.load %arg1[%c16] : memref<98xf32, #tpu.memory_space<smem>>
    %c17 = arith.constant 17 : index
    %17 = memref.load %arg1[%c17] : memref<98xf32, #tpu.memory_space<smem>>
    %c18 = arith.constant 18 : index
    %18 = memref.load %arg1[%c18] : memref<98xf32, #tpu.memory_space<smem>>
    %c19 = arith.constant 19 : index
    %19 = memref.load %arg1[%c19] : memref<98xf32, #tpu.memory_space<smem>>
    %c20 = arith.constant 20 : index
    %20 = memref.load %arg1[%c20] : memref<98xf32, #tpu.memory_space<smem>>
    %c21 = arith.constant 21 : index
    %21 = memref.load %arg1[%c21] : memref<98xf32, #tpu.memory_space<smem>>
    %c22 = arith.constant 22 : index
    %22 = memref.load %arg1[%c22] : memref<98xf32, #tpu.memory_space<smem>>
    %c23 = arith.constant 23 : index
    %23 = memref.load %arg1[%c23] : memref<98xf32, #tpu.memory_space<smem>>
    %c24 = arith.constant 24 : index
    %24 = memref.load %arg1[%c24] : memref<98xf32, #tpu.memory_space<smem>>
    %c25 = arith.constant 25 : index
    %25 = memref.load %arg1[%c25] : memref<98xf32, #tpu.memory_space<smem>>
    %c26 = arith.constant 26 : index
    %26 = memref.load %arg1[%c26] : memref<98xf32, #tpu.memory_space<smem>>
    %c27 = arith.constant 27 : index
    %27 = memref.load %arg1[%c27] : memref<98xf32, #tpu.memory_space<smem>>
    %c28 = arith.constant 28 : index
    %28 = memref.load %arg1[%c28] : memref<98xf32, #tpu.memory_space<smem>>
    %c29 = arith.constant 29 : index
    %29 = memref.load %arg1[%c29] : memref<98xf32, #tpu.memory_space<smem>>
    %c30 = arith.constant 30 : index
    %30 = memref.load %arg1[%c30] : memref<98xf32, #tpu.memory_space<smem>>
    %c31 = arith.constant 31 : index
    %31 = memref.load %arg1[%c31] : memref<98xf32, #tpu.memory_space<smem>>
    %c32 = arith.constant 32 : index
    %32 = memref.load %arg1[%c32] : memref<98xf32, #tpu.memory_space<smem>>
    %c33 = arith.constant 33 : index
    %33 = memref.load %arg1[%c33] : memref<98xf32, #tpu.memory_space<smem>>
    %c34 = arith.constant 34 : index
    %34 = memref.load %arg1[%c34] : memref<98xf32, #tpu.memory_space<smem>>
    %c35 = arith.constant 35 : index
    %35 = memref.load %arg1[%c35] : memref<98xf32, #tpu.memory_space<smem>>
    %c36 = arith.constant 36 : index
    %36 = memref.load %arg1[%c36] : memref<98xf32, #tpu.memory_space<smem>>
    %c37 = arith.constant 37 : index
    %37 = memref.load %arg1[%c37] : memref<98xf32, #tpu.memory_space<smem>>
    %c38 = arith.constant 38 : index
    %38 = memref.load %arg1[%c38] : memref<98xf32, #tpu.memory_space<smem>>
    %c39 = arith.constant 39 : index
    %39 = memref.load %arg1[%c39] : memref<98xf32, #tpu.memory_space<smem>>
    %c40 = arith.constant 40 : index
    %40 = memref.load %arg1[%c40] : memref<98xf32, #tpu.memory_space<smem>>
    %c41 = arith.constant 41 : index
    %41 = memref.load %arg1[%c41] : memref<98xf32, #tpu.memory_space<smem>>
    %c42 = arith.constant 42 : index
    %42 = memref.load %arg1[%c42] : memref<98xf32, #tpu.memory_space<smem>>
    %c43 = arith.constant 43 : index
    %43 = memref.load %arg1[%c43] : memref<98xf32, #tpu.memory_space<smem>>
    %c44 = arith.constant 44 : index
    %44 = memref.load %arg1[%c44] : memref<98xf32, #tpu.memory_space<smem>>
    %c45 = arith.constant 45 : index
    %45 = memref.load %arg1[%c45] : memref<98xf32, #tpu.memory_space<smem>>
    %c46 = arith.constant 46 : index
    %46 = memref.load %arg1[%c46] : memref<98xf32, #tpu.memory_space<smem>>
    %c47 = arith.constant 47 : index
    %47 = memref.load %arg1[%c47] : memref<98xf32, #tpu.memory_space<smem>>
    %c48 = arith.constant 48 : index
    %48 = memref.load %arg1[%c48] : memref<98xf32, #tpu.memory_space<smem>>
    %c49 = arith.constant 49 : index
    %49 = memref.load %arg1[%c49] : memref<98xf32, #tpu.memory_space<smem>>
    %c50 = arith.constant 50 : index
    %50 = memref.load %arg1[%c50] : memref<98xf32, #tpu.memory_space<smem>>
    %c51 = arith.constant 51 : index
    %51 = memref.load %arg1[%c51] : memref<98xf32, #tpu.memory_space<smem>>
    %c52 = arith.constant 52 : index
    %52 = memref.load %arg1[%c52] : memref<98xf32, #tpu.memory_space<smem>>
    %c53 = arith.constant 53 : index
    %53 = memref.load %arg1[%c53] : memref<98xf32, #tpu.memory_space<smem>>
    %c54 = arith.constant 54 : index
    %54 = memref.load %arg1[%c54] : memref<98xf32, #tpu.memory_space<smem>>
    %c55 = arith.constant 55 : index
    %55 = memref.load %arg1[%c55] : memref<98xf32, #tpu.memory_space<smem>>
    %c56 = arith.constant 56 : index
    %56 = memref.load %arg1[%c56] : memref<98xf32, #tpu.memory_space<smem>>
    %c57 = arith.constant 57 : index
    %57 = memref.load %arg1[%c57] : memref<98xf32, #tpu.memory_space<smem>>
    %c58 = arith.constant 58 : index
    %58 = memref.load %arg1[%c58] : memref<98xf32, #tpu.memory_space<smem>>
    %c59 = arith.constant 59 : index
    %59 = memref.load %arg1[%c59] : memref<98xf32, #tpu.memory_space<smem>>
    %c60 = arith.constant 60 : index
    %60 = memref.load %arg1[%c60] : memref<98xf32, #tpu.memory_space<smem>>
    %c61 = arith.constant 61 : index
    %61 = memref.load %arg1[%c61] : memref<98xf32, #tpu.memory_space<smem>>
    %c62 = arith.constant 62 : index
    %62 = memref.load %arg1[%c62] : memref<98xf32, #tpu.memory_space<smem>>
    %c63 = arith.constant 63 : index
    %63 = memref.load %arg1[%c63] : memref<98xf32, #tpu.memory_space<smem>>
    %c64 = arith.constant 64 : index
    %64 = memref.load %arg1[%c64] : memref<98xf32, #tpu.memory_space<smem>>
    %c65 = arith.constant 65 : index
    %65 = memref.load %arg1[%c65] : memref<98xf32, #tpu.memory_space<smem>>
    %c66 = arith.constant 66 : index
    %66 = memref.load %arg1[%c66] : memref<98xf32, #tpu.memory_space<smem>>
    %c67 = arith.constant 67 : index
    %67 = memref.load %arg1[%c67] : memref<98xf32, #tpu.memory_space<smem>>
    %c68 = arith.constant 68 : index
    %68 = memref.load %arg1[%c68] : memref<98xf32, #tpu.memory_space<smem>>
    %c69 = arith.constant 69 : index
    %69 = memref.load %arg1[%c69] : memref<98xf32, #tpu.memory_space<smem>>
    %c70 = arith.constant 70 : index
    %70 = memref.load %arg1[%c70] : memref<98xf32, #tpu.memory_space<smem>>
    %c71 = arith.constant 71 : index
    %71 = memref.load %arg1[%c71] : memref<98xf32, #tpu.memory_space<smem>>
    %c72 = arith.constant 72 : index
    %72 = memref.load %arg1[%c72] : memref<98xf32, #tpu.memory_space<smem>>
    %c73 = arith.constant 73 : index
    %73 = memref.load %arg1[%c73] : memref<98xf32, #tpu.memory_space<smem>>
    %c74 = arith.constant 74 : index
    %74 = memref.load %arg1[%c74] : memref<98xf32, #tpu.memory_space<smem>>
    %c75 = arith.constant 75 : index
    %75 = memref.load %arg1[%c75] : memref<98xf32, #tpu.memory_space<smem>>
    %c76 = arith.constant 76 : index
    %76 = memref.load %arg1[%c76] : memref<98xf32, #tpu.memory_space<smem>>
    %c77 = arith.constant 77 : index
    %77 = memref.load %arg1[%c77] : memref<98xf32, #tpu.memory_space<smem>>
    %c78 = arith.constant 78 : index
    %78 = memref.load %arg1[%c78] : memref<98xf32, #tpu.memory_space<smem>>
    %c79 = arith.constant 79 : index
    %79 = memref.load %arg1[%c79] : memref<98xf32, #tpu.memory_space<smem>>
    %c80 = arith.constant 80 : index
    %80 = memref.load %arg1[%c80] : memref<98xf32, #tpu.memory_space<smem>>
    %c81 = arith.constant 81 : index
    %81 = memref.load %arg1[%c81] : memref<98xf32, #tpu.memory_space<smem>>
    %c82 = arith.constant 82 : index
    %82 = memref.load %arg1[%c82] : memref<98xf32, #tpu.memory_space<smem>>
    %c83 = arith.constant 83 : index
    %83 = memref.load %arg1[%c83] : memref<98xf32, #tpu.memory_space<smem>>
    %c84 = arith.constant 84 : index
    %84 = memref.load %arg1[%c84] : memref<98xf32, #tpu.memory_space<smem>>
    %c85 = arith.constant 85 : index
    %85 = memref.load %arg1[%c85] : memref<98xf32, #tpu.memory_space<smem>>
    %c86 = arith.constant 86 : index
    %86 = memref.load %arg1[%c86] : memref<98xf32, #tpu.memory_space<smem>>
    %c87 = arith.constant 87 : index
    %87 = memref.load %arg1[%c87] : memref<98xf32, #tpu.memory_space<smem>>
    %c88 = arith.constant 88 : index
    %88 = memref.load %arg1[%c88] : memref<98xf32, #tpu.memory_space<smem>>
    %c89 = arith.constant 89 : index
    %89 = memref.load %arg1[%c89] : memref<98xf32, #tpu.memory_space<smem>>
    %c90 = arith.constant 90 : index
    %90 = memref.load %arg1[%c90] : memref<98xf32, #tpu.memory_space<smem>>
    %c91 = arith.constant 91 : index
    %91 = memref.load %arg1[%c91] : memref<98xf32, #tpu.memory_space<smem>>
    %c92 = arith.constant 92 : index
    %92 = memref.load %arg1[%c92] : memref<98xf32, #tpu.memory_space<smem>>
    %c93 = arith.constant 93 : index
    %93 = memref.load %arg1[%c93] : memref<98xf32, #tpu.memory_space<smem>>
    %c94 = arith.constant 94 : index
    %94 = memref.load %arg1[%c94] : memref<98xf32, #tpu.memory_space<smem>>
    %c95 = arith.constant 95 : index
    %95 = memref.load %arg1[%c95] : memref<98xf32, #tpu.memory_space<smem>>
    %c96 = arith.constant 96 : index
    %96 = memref.load %arg1[%c96] : memref<98xf32, #tpu.memory_space<smem>>
    %c97 = arith.constant 97 : index
    %97 = memref.load %arg1[%c97] : memref<98xf32, #tpu.memory_space<smem>>
    %c0_0 = arith.constant 0 : index
    %c0_1 = arith.constant 0 : index
    %98 = vector.load %arg2[%c0_0, %c0_1] : memref<32x2xf32, #tpu.memory_space<vmem>>, vector<32x2xf32>
    %c0_2 = arith.constant 0 : index
    %c0_3 = arith.constant 0 : index
    %99 = vector.load %arg3[%c0_2, %c0_3] : memref<32x2xf32, #tpu.memory_space<vmem>>, vector<32x2xf32>
    %100 = tpu.iota {dimensions = array<i32: 1>} : vector<1x256xi32>
    %c16_i32 = arith.constant 16 : i32
    %c0_i32 = arith.constant 0 : i32
    %101 = arith.cmpi eq, %c16_i32, %c0_i32 : i32
    %c1_i32 = arith.constant 1 : i32
    %102 = arith.select %101, %c1_i32, %c16_i32 : i32
    %103 = vector.broadcast %102 : i32 to vector<1x256xi32>
    %104 = arith.remsi %100, %103 : vector<1x256xi32>
    %c0_i32_4 = arith.constant 0 : i32
    %105 = vector.broadcast %c0_i32_4 : i32 to vector<1x256xi32>
    %106 = arith.cmpi ne, %104, %105 : vector<1x256xi32>
    %c0_i32_5 = arith.constant 0 : i32
    %107 = vector.broadcast %c0_i32_5 : i32 to vector<1x256xi32>
    %108 = arith.cmpi slt, %104, %107 : vector<1x256xi32>
    %c0_i32_6 = arith.constant 0 : i32
    %109 = arith.cmpi slt, %102, %c0_i32_6 : i32
    %110 = vector.broadcast %109 : i1 to vector<1x256xi1>
    %111 = vector.broadcast %110 : vector<1x256xi1> to vector<1x256xi1>
    %112 = arith.xori %108, %111 : vector<1x256xi1>
    %113 = arith.andi %112, %106 : vector<1x256xi1>
    %114 = vector.broadcast %102 : i32 to vector<1x256xi32>
    %115 = arith.addi %104, %114 : vector<1x256xi32>
    %116 = arith.select %113, %115, %104 : vector<1x256xi1>, vector<1x256xi32>
    %cst = arith.constant 0.000000e+00 : f32
    %117 = vector.broadcast %cst : f32 to vector<1x128xf32>
    %c0_7 = arith.constant 0 : index
    %c0_8 = arith.constant 0 : index
    %118 = vector.load %arg6[%c0_7, %c0_8] : memref<1x512xf32, #tpu.memory_space<vmem>>, vector<1x128xf32>
    tpu.vector_store %arg6[%c0_7, %c0_8], %117 {strides = array<i32>} : memref<1x512xf32, #tpu.memory_space<vmem>>, vector<1x128xf32>,
    %c0_9 = arith.constant 0 : index
    %c384 = arith.constant 384 : index
    %119 = vector.load %arg6[%c0_9, %c384] : memref<1x512xf32, #tpu.memory_space<vmem>>, vector<1x128xf32>
    tpu.vector_store %arg6[%c0_9, %c384], %117 {strides = array<i32>} : memref<1x512xf32, #tpu.memory_space<vmem>>, vector<1x128xf32>,
    %c0_10 = arith.constant 0 : index
    %c0_11 = arith.constant 0 : index
    %120 = vector.load %arg7[%c0_10, %c0_11] : memref<1x512xf32, #tpu.memory_space<vmem>>, vector<1x128xf32>
    tpu.vector_store %arg7[%c0_10, %c0_11], %117 {strides = array<i32>} : memref<1x512xf32, #tpu.memory_space<vmem>>, vector<1x128xf32>,
    %c0_12 = arith.constant 0 : index
    %c384_13 = arith.constant 384 : index
    %121 = vector.load %arg7[%c0_12, %c384_13] : memref<1x512xf32, #tpu.memory_space<vmem>>, vector<1x128xf32>
    tpu.vector_store %arg7[%c0_12, %c384_13], %117 {strides = array<i32>} : memref<1x512xf32, #tpu.memory_space<vmem>>, vector<1x128xf32>,
    %c0_14 = arith.constant 0 : index
    %c0_15 = arith.constant 0 : index
    %c0_16 = arith.constant 0 : index
    %122 = vector.load %arg4[%c0_14, %c0_15, %c0_16] : memref<1x32x256xf32, #tpu.memory_space<vmem>>, vector<1x32x256xf32>
    %123 = vector.shape_cast %122 : vector<1x32x256xf32> to vector<32x256xf32>
    %cst_17 = arith.constant dense<0.000000e+00> : vector<32xf32>
    %124 = vector.multi_reduction <add>, %123, %cst_17 [1] : vector<32x256xf32> to vector<32xf32>
    %125 = vector.shape_cast %124 : vector<32xf32> to vector<32x1xf32>
    %cst_18 = arith.constant 2.560000e+02 : f32
    %126 = vector.broadcast %cst_18 : f32 to vector<32x1xf32>
    %127 = arith.divf %125, %126 : vector<32x1xf32>
    %cst_19 = arith.constant dense<0xFF800000> : vector<32xf32>
    %128 = vector.multi_reduction <maximumf>, %123, %cst_19 [1] : vector<32x256xf32> to vector<32xf32>
    %129 = vector.shape_cast %128 : vector<32xf32> to vector<32x1xf32>
    %130 = vector.broadcast %127 : vector<32x1xf32> to vector<32x2xf32>
    %131 = arith.mulf %98, %130 : vector<32x2xf32>
    %cst_20 = arith.constant dense<0.000000e+00> : vector<2xf32>
    %132 = vector.multi_reduction <add>, %131, %cst_20 [0] : vector<32x2xf32> to vector<2xf32>
    %133 = vector.shape_cast %132 : vector<2xf32> to vector<1x2xf32>
    %cst_21 = arith.constant 0.000000e+00 : f32
    %134 = vector.broadcast %cst_21 : f32 to vector<1x2xf32>
    %135 = arith.maximumf %133, %134 : vector<1x2xf32>
    %136 = vector.broadcast %135 : vector<1x2xf32> to vector<32x2xf32>
    %137 = arith.mulf %99, %136 : vector<32x2xf32>
    %cst_22 = arith.constant dense<0.000000e+00> : vector<32xf32>
    %138 = vector.multi_reduction <add>, %137, %cst_22 [1] : vector<32x2xf32> to vector<32xf32>
    %139 = vector.shape_cast %138 : vector<32xf32> to vector<32x1xf32>
    %140 = vector.broadcast %129 : vector<32x1xf32> to vector<32x2xf32>
    %141 = arith.mulf %98, %140 : vector<32x2xf32>
    %cst_23 = arith.constant dense<0.000000e+00> : vector<2xf32>
    %142 = vector.multi_reduction <add>, %141, %cst_23 [0] : vector<32x2xf32> to vector<2xf32>
    %143 = vector.shape_cast %142 : vector<2xf32> to vector<1x2xf32>
    %cst_24 = arith.constant 0.000000e+00 : f32
    %144 = vector.broadcast %cst_24 : f32 to vector<1x2xf32>
    %145 = arith.maximumf %143, %144 : vector<1x2xf32>
    %146 = vector.broadcast %145 : vector<1x2xf32> to vector<32x2xf32>
    %147 = arith.mulf %99, %146 : vector<32x2xf32>
    %cst_25 = arith.constant dense<0.000000e+00> : vector<32xf32>
    %148 = vector.multi_reduction <add>, %147, %cst_25 [1] : vector<32x2xf32> to vector<32xf32>
    %149 = vector.shape_cast %148 : vector<32xf32> to vector<32x1xf32>
    %150 = arith.addf %139, %149 : vector<32x1xf32>
    %151 = arith.negf %150 : vector<32x1xf32>
    %152 = math.exp %151 : vector<32x1xf32>
    %cst_26 = arith.constant 1.000000e+00 : f32
    %153 = vector.broadcast %cst_26 : f32 to vector<32x1xf32>
    %154 = arith.addf %153, %152 : vector<32x1xf32>
    %155 = arith.divf %153, %154 : vector<32x1xf32>
    %c0_27 = arith.constant 0 : index
    %c0_28 = arith.constant 0 : index
    %156 = vector.load %arg8[%c0_27, %c0_28] : memref<32x1xf32, #tpu.memory_space<vmem>>, vector<32x1xf32>
    tpu.vector_store %arg8[%c0_27, %c0_28], %155 {strides = array<i32>} : memref<32x1xf32, #tpu.memory_space<vmem>>, vector<32x1xf32>,
    %157 = vector.broadcast %155 : vector<32x1xf32> to vector<32x256xf32>
    %158 = arith.mulf %123, %157 : vector<32x256xf32>
    %cst_29 = arith.constant dense<0.000000e+00> : vector<256xf32>
    %159 = vector.multi_reduction <add>, %158, %cst_29 [0] : vector<32x256xf32> to vector<256xf32>
    %160 = vector.shape_cast %159 : vector<256xf32> to vector<1x256xf32>
    %cst_30 = arith.constant 3.200000e+01 : f32
    %161 = vector.broadcast %cst_30 : f32 to vector<1x256xf32>
    %162 = arith.divf %160, %161 : vector<1x256xf32>
    %c0_31 = arith.constant 0 : index
    %c128 = arith.constant 128 : index
    %163 = vector.load %arg6[%c0_31, %c128] : memref<1x512xf32, #tpu.memory_space<vmem>>, vector<1x256xf32>
    tpu.vector_store %arg6[%c0_31, %c128], %162 {strides = array<i32>} : memref<1x512xf32, #tpu.memory_space<vmem>>, vector<1x256xf32>,
    %cst_32 = arith.constant dense<0xFF800000> : vector<256xf32>
    %164 = vector.multi_reduction <maximumf>, %158, %cst_32 [0] : vector<32x256xf32> to vector<256xf32>
    %165 = vector.shape_cast %164 : vector<256xf32> to vector<1x256xf32>
    %c0_33 = arith.constant 0 : index
    %c128_34 = arith.constant 128 : index
    %166 = vector.load %arg7[%c0_33, %c128_34] : memref<1x512xf32, #tpu.memory_space<vmem>>, vector<1x256xf32>
    tpu.vector_store %arg7[%c0_33, %c128_34], %165 {strides = array<i32>} : memref<1x512xf32, #tpu.memory_space<vmem>>, vector<1x256xf32>,
    %cst_35 = arith.constant 0.000000e+00 : f32
    %167 = vector.broadcast %cst_35 : f32 to vector<1x256xf32>
    %cst_36 = arith.constant 0.000000e+00 : f32
    %168 = vector.broadcast %cst_36 : f32 to vector<1x256xf32>
    %c0_37 = arith.constant 0 : index
    %c77_38 = arith.constant 77 : index
    %169 = vector.load %arg6[%c0_37, %c77_38] : memref<1x512xf32, #tpu.memory_space<vmem>>, vector<1x256xf32>
    %c0_39 = arith.constant 0 : index
    %c77_40 = arith.constant 77 : index
    %170 = vector.load %arg7[%c0_39, %c77_40] : memref<1x512xf32, #tpu.memory_space<vmem>>, vector<1x256xf32>
    %171 = vector.broadcast %0 : f32 to vector<1x256xf32>
    %172 = arith.mulf %171, %169 : vector<1x256xf32>
    %173 = vector.broadcast %49 : f32 to vector<1x256xf32>
    %174 = arith.mulf %173, %170 : vector<1x256xf32>
    %175 = arith.addf %172, %174 : vector<1x256xf32>
    %176 = arith.addf %168, %175 : vector<1x256xf32>
    %c0_41 = arith.constant 0 : index
    %c93_42 = arith.constant 93 : index
    %177 = vector.load %arg6[%c0_41, %c93_42] : memref<1x512xf32, #tpu.memory_space<vmem>>, vector<1x256xf32>
    %c0_43 = arith.constant 0 : index
    %c93_44 = arith.constant 93 : index
    %178 = vector.load %arg7[%c0_43, %c93_44] : memref<1x512xf32, #tpu.memory_space<vmem>>, vector<1x256xf32>
    %179 = vector.broadcast %7 : f32 to vector<1x256xf32>
    %180 = arith.mulf %179, %177 : vector<1x256xf32>
    %181 = vector.broadcast %56 : f32 to vector<1x256xf32>
    %182 = arith.mulf %181, %178 : vector<1x256xf32>
    %183 = arith.addf %180, %182 : vector<1x256xf32>
    %184 = arith.addf %176, %183 : vector<1x256xf32>
    %c0_45 = arith.constant 0 : index
    %c109 = arith.constant 109 : index
    %185 = vector.load %arg6[%c0_45, %c109] : memref<1x512xf32, #tpu.memory_space<vmem>>, vector<1x256xf32>
    %c0_46 = arith.constant 0 : index
    %c109_47 = arith.constant 109 : index
    %186 = vector.load %arg7[%c0_46, %c109_47] : memref<1x512xf32, #tpu.memory_space<vmem>>, vector<1x256xf32>
    %187 = vector.broadcast %14 : f32 to vector<1x256xf32>
    %188 = arith.mulf %187, %185 : vector<1x256xf32>
    %189 = vector.broadcast %63 : f32 to vector<1x256xf32>
    %190 = arith.mulf %189, %186 : vector<1x256xf32>
    %191 = arith.addf %188, %190 : vector<1x256xf32>
    %192 = arith.addf %184, %191 : vector<1x256xf32>
    %c0_48 = arith.constant 0 : index
    %c125 = arith.constant 125 : index
    %193 = vector.load %arg6[%c0_48, %c125] : memref<1x512xf32, #tpu.memory_space<vmem>>, vector<1x256xf32>
    %c0_49 = arith.constant 0 : index
    %c125_50 = arith.constant 125 : index
    %194 = vector.load %arg7[%c0_49, %c125_50] : memref<1x512xf32, #tpu.memory_space<vmem>>, vector<1x256xf32>
    %195 = vector.broadcast %21 : f32 to vector<1x256xf32>
    %196 = arith.mulf %195, %193 : vector<1x256xf32>
    %197 = vector.broadcast %70 : f32 to vector<1x256xf32>
    %198 = arith.mulf %197, %194 : vector<1x256xf32>
    %199 = arith.addf %196, %198 : vector<1x256xf32>
    %200 = arith.addf %192, %199 : vector<1x256xf32>
    %c0_51 = arith.constant 0 : index
    %c141 = arith.constant 141 : index
    %201 = vector.load %arg6[%c0_51, %c141] : memref<1x512xf32, #tpu.memory_space<vmem>>, vector<1x256xf32>
    %c0_52 = arith.constant 0 : index
    %c141_53 = arith.constant 141 : index
    %202 = vector.load %arg7[%c0_52, %c141_53] : memref<1x512xf32, #tpu.memory_space<vmem>>, vector<1x256xf32>
    %203 = vector.broadcast %28 : f32 to vector<1x256xf32>
    %204 = arith.mulf %203, %201 : vector<1x256xf32>
    %205 = vector.broadcast %77 : f32 to vector<1x256xf32>
    %206 = arith.mulf %205, %202 : vector<1x256xf32>
    %207 = arith.addf %204, %206 : vector<1x256xf32>
    %208 = arith.addf %200, %207 : vector<1x256xf32>
    %c0_54 = arith.constant 0 : index
    %c157 = arith.constant 157 : index
    %209 = vector.load %arg6[%c0_54, %c157] : memref<1x512xf32, #tpu.memory_space<vmem>>, vector<1x256xf32>
    %c0_55 = arith.constant 0 : index
    %c157_56 = arith.constant 157 : index
    %210 = vector.load %arg7[%c0_55, %c157_56] : memref<1x512xf32, #tpu.memory_space<vmem>>, vector<1x256xf32>
    %211 = vector.broadcast %35 : f32 to vector<1x256xf32>
    %212 = arith.mulf %211, %209 : vector<1x256xf32>
    %213 = vector.broadcast %84 : f32 to vector<1x256xf32>
    %214 = arith.mulf %213, %210 : vector<1x256xf32>
    %215 = arith.addf %212, %214 : vector<1x256xf32>
    %216 = arith.addf %208, %215 : vector<1x256xf32>
    %c0_57 = arith.constant 0 : index
    %c173 = arith.constant 173 : index
    %217 = vector.load %arg6[%c0_57, %c173] : memref<1x512xf32, #tpu.memory_space<vmem>>, vector<1x256xf32>
    %c0_58 = arith.constant 0 : index
    %c173_59 = arith.constant 173 : index
    %218 = vector.load %arg7[%c0_58, %c173_59] : memref<1x512xf32, #tpu.memory_space<vmem>>, vector<1x256xf32>
    %219 = vector.broadcast %42 : f32 to vector<1x256xf32>
    %220 = arith.mulf %219, %217 : vector<1x256xf32>
    %221 = vector.broadcast %91 : f32 to vector<1x256xf32>
    %222 = arith.mulf %221, %218 : vector<1x256xf32>
    %223 = arith.addf %220, %222 : vector<1x256xf32>
    %224 = arith.addf %216, %223 : vector<1x256xf32>
    %c3_i32 = arith.constant 3 : i32
    %225 = vector.broadcast %c3_i32 : i32 to vector<1x256xi32>
    %226 = arith.cmpi sge, %116, %225 : vector<1x256xi32>
    %cst_60 = arith.constant 0.000000e+00 : f32
    %227 = vector.broadcast %cst_60 : f32 to vector<1x256xf32>
    %228 = arith.select %226, %224, %227 : vector<1x256xi1>, vector<1x256xf32>
    %229 = arith.addf %167, %228 : vector<1x256xf32>
    %cst_61 = arith.constant 0.000000e+00 : f32
    %230 = vector.broadcast %cst_61 : f32 to vector<1x256xf32>
    %c0_62 = arith.constant 0 : index
    %c78_63 = arith.constant 78 : index
    %231 = vector.load %arg6[%c0_62, %c78_63] : memref<1x512xf32, #tpu.memory_space<vmem>>, vector<1x256xf32>
    %c0_64 = arith.constant 0 : index
    %c78_65 = arith.constant 78 : index
    %232 = vector.load %arg7[%c0_64, %c78_65] : memref<1x512xf32, #tpu.memory_space<vmem>>, vector<1x256xf32>
    %233 = vector.broadcast %1 : f32 to vector<1x256xf32>
    %234 = arith.mulf %233, %231 : vector<1x256xf32>
    %235 = vector.broadcast %50 : f32 to vector<1x256xf32>
    %236 = arith.mulf %235, %232 : vector<1x256xf32>
    %237 = arith.addf %234, %236 : vector<1x256xf32>
    %238 = arith.addf %230, %237 : vector<1x256xf32>
    %c0_66 = arith.constant 0 : index
    %c94_67 = arith.constant 94 : index
    %239 = vector.load %arg6[%c0_66, %c94_67] : memref<1x512xf32, #tpu.memory_space<vmem>>, vector<1x256xf32>
    %c0_68 = arith.constant 0 : index
    %c94_69 = arith.constant 94 : index
    %240 = vector.load %arg7[%c0_68, %c94_69] : memref<1x512xf32, #tpu.memory_space<vmem>>, vector<1x256xf32>
    %241 = vector.broadcast %8 : f32 to vector<1x256xf32>
    %242 = arith.mulf %241, %239 : vector<1x256xf32>
    %243 = vector.broadcast %57 : f32 to vector<1x256xf32>
    %244 = arith.mulf %243, %240 : vector<1x256xf32>
    %245 = arith.addf %242, %244 : vector<1x256xf32>
    %246 = arith.addf %238, %245 : vector<1x256xf32>
    %c0_70 = arith.constant 0 : index
    %c110 = arith.constant 110 : index
    %247 = vector.load %arg6[%c0_70, %c110] : memref<1x512xf32, #tpu.memory_space<vmem>>, vector<1x256xf32>
    %c0_71 = arith.constant 0 : index
    %c110_72 = arith.constant 110 : index
    %248 = vector.load %arg7[%c0_71, %c110_72] : memref<1x512xf32, #tpu.memory_space<vmem>>, vector<1x256xf32>
    %249 = vector.broadcast %15 : f32 to vector<1x256xf32>
    %250 = arith.mulf %249, %247 : vector<1x256xf32>
    %251 = vector.broadcast %64 : f32 to vector<1x256xf32>
    %252 = arith.mulf %251, %248 : vector<1x256xf32>
    %253 = arith.addf %250, %252 : vector<1x256xf32>
    %254 = arith.addf %246, %253 : vector<1x256xf32>
    %c0_73 = arith.constant 0 : index
    %c126 = arith.constant 126 : index
    %255 = vector.load %arg6[%c0_73, %c126] : memref<1x512xf32, #tpu.memory_space<vmem>>, vector<1x256xf32>
    %c0_74 = arith.constant 0 : index
    %c126_75 = arith.constant 126 : index
    %256 = vector.load %arg7[%c0_74, %c126_75] : memref<1x512xf32, #tpu.memory_space<vmem>>, vector<1x256xf32>
    %257 = vector.broadcast %22 : f32 to vector<1x256xf32>
    %258 = arith.mulf %257, %255 : vector<1x256xf32>
    %259 = vector.broadcast %71 : f32 to vector<1x256xf32>
    %260 = arith.mulf %259, %256 : vector<1x256xf32>
    %261 = arith.addf %258, %260 : vector<1x256xf32>
    %262 = arith.addf %254, %261 : vector<1x256xf32>
    %c0_76 = arith.constant 0 : index
    %c142 = arith.constant 142 : index
    %263 = vector.load %arg6[%c0_76, %c142] : memref<1x512xf32, #tpu.memory_space<vmem>>, vector<1x256xf32>
    %c0_77 = arith.constant 0 : index
    %c142_78 = arith.constant 142 : index
    %264 = vector.load %arg7[%c0_77, %c142_78] : memref<1x512xf32, #tpu.memory_space<vmem>>, vector<1x256xf32>
    %265 = vector.broadcast %29 : f32 to vector<1x256xf32>
    %266 = arith.mulf %265, %263 : vector<1x256xf32>
    %267 = vector.broadcast %78 : f32 to vector<1x256xf32>
    %268 = arith.mulf %267, %264 : vector<1x256xf32>
    %269 = arith.addf %266, %268 : vector<1x256xf32>
    %270 = arith.addf %262, %269 : vector<1x256xf32>
    %c0_79 = arith.constant 0 : index
    %c158 = arith.constant 158 : index
    %271 = vector.load %arg6[%c0_79, %c158] : memref<1x512xf32, #tpu.memory_space<vmem>>, vector<1x256xf32>
    %c0_80 = arith.constant 0 : index
    %c158_81 = arith.constant 158 : index
    %272 = vector.load %arg7[%c0_80, %c158_81] : memref<1x512xf32, #tpu.memory_space<vmem>>, vector<1x256xf32>
    %273 = vector.broadcast %36 : f32 to vector<1x256xf32>
    %274 = arith.mulf %273, %271 : vector<1x256xf32>
    %275 = vector.broadcast %85 : f32 to vector<1x256xf32>
    %276 = arith.mulf %275, %272 : vector<1x256xf32>
    %277 = arith.addf %274, %276 : vector<1x256xf32>
    %278 = arith.addf %270, %277 : vector<1x256xf32>
    %c0_82 = arith.constant 0 : index
    %c174 = arith.constant 174 : index
    %279 = vector.load %arg6[%c0_82, %c174] : memref<1x512xf32, #tpu.memory_space<vmem>>, vector<1x256xf32>
    %c0_83 = arith.constant 0 : index
    %c174_84 = arith.constant 174 : index
    %280 = vector.load %arg7[%c0_83, %c174_84] : memref<1x512xf32, #tpu.memory_space<vmem>>, vector<1x256xf32>
    %281 = vector.broadcast %43 : f32 to vector<1x256xf32>
    %282 = arith.mulf %281, %279 : vector<1x256xf32>
    %283 = vector.broadcast %92 : f32 to vector<1x256xf32>
    %284 = arith.mulf %283, %280 : vector<1x256xf32>
    %285 = arith.addf %282, %284 : vector<1x256xf32>
    %286 = arith.addf %278, %285 : vector<1x256xf32>
    %c2_i32 = arith.constant 2 : i32
    %287 = vector.broadcast %c2_i32 : i32 to vector<1x256xi32>
    %288 = arith.cmpi sge, %116, %287 : vector<1x256xi32>
    %cst_85 = arith.constant 0.000000e+00 : f32
    %289 = vector.broadcast %cst_85 : f32 to vector<1x256xf32>
    %290 = arith.select %288, %286, %289 : vector<1x256xi1>, vector<1x256xf32>
    %291 = arith.addf %229, %290 : vector<1x256xf32>
    %cst_86 = arith.constant 0.000000e+00 : f32
    %292 = vector.broadcast %cst_86 : f32 to vector<1x256xf32>
    %c0_87 = arith.constant 0 : index
    %c79_88 = arith.constant 79 : index
    %293 = vector.load %arg6[%c0_87, %c79_88] : memref<1x512xf32, #tpu.memory_space<vmem>>, vector<1x256xf32>
    %c0_89 = arith.constant 0 : index
    %c79_90 = arith.constant 79 : index
    %294 = vector.load %arg7[%c0_89, %c79_90] : memref<1x512xf32, #tpu.memory_space<vmem>>, vector<1x256xf32>
    %295 = vector.broadcast %2 : f32 to vector<1x256xf32>
    %296 = arith.mulf %295, %293 : vector<1x256xf32>
    %297 = vector.broadcast %51 : f32 to vector<1x256xf32>
    %298 = arith.mulf %297, %294 : vector<1x256xf32>
    %299 = arith.addf %296, %298 : vector<1x256xf32>
    %300 = arith.addf %292, %299 : vector<1x256xf32>
    %c0_91 = arith.constant 0 : index
    %c95_92 = arith.constant 95 : index
    %301 = vector.load %arg6[%c0_91, %c95_92] : memref<1x512xf32, #tpu.memory_space<vmem>>, vector<1x256xf32>
    %c0_93 = arith.constant 0 : index
    %c95_94 = arith.constant 95 : index
    %302 = vector.load %arg7[%c0_93, %c95_94] : memref<1x512xf32, #tpu.memory_space<vmem>>, vector<1x256xf32>
    %303 = vector.broadcast %9 : f32 to vector<1x256xf32>
    %304 = arith.mulf %303, %301 : vector<1x256xf32>
    %305 = vector.broadcast %58 : f32 to vector<1x256xf32>
    %306 = arith.mulf %305, %302 : vector<1x256xf32>
    %307 = arith.addf %304, %306 : vector<1x256xf32>
    %308 = arith.addf %300, %307 : vector<1x256xf32>
    %c0_95 = arith.constant 0 : index
    %c111 = arith.constant 111 : index
    %309 = vector.load %arg6[%c0_95, %c111] : memref<1x512xf32, #tpu.memory_space<vmem>>, vector<1x256xf32>
    %c0_96 = arith.constant 0 : index
    %c111_97 = arith.constant 111 : index
    %310 = vector.load %arg7[%c0_96, %c111_97] : memref<1x512xf32, #tpu.memory_space<vmem>>, vector<1x256xf32>
    %311 = vector.broadcast %16 : f32 to vector<1x256xf32>
    %312 = arith.mulf %311, %309 : vector<1x256xf32>
    %313 = vector.broadcast %65 : f32 to vector<1x256xf32>
    %314 = arith.mulf %313, %310 : vector<1x256xf32>
    %315 = arith.addf %312, %314 : vector<1x256xf32>
    %316 = arith.addf %308, %315 : vector<1x256xf32>
    %c0_98 = arith.constant 0 : index
    %c127 = arith.constant 127 : index
    %317 = vector.load %arg6[%c0_98, %c127] : memref<1x512xf32, #tpu.memory_space<vmem>>, vector<1x256xf32>
    %c0_99 = arith.constant 0 : index
    %c127_100 = arith.constant 127 : index
    %318 = vector.load %arg7[%c0_99, %c127_100] : memref<1x512xf32, #tpu.memory_space<vmem>>, vector<1x256xf32>
    %319 = vector.broadcast %23 : f32 to vector<1x256xf32>
    %320 = arith.mulf %319, %317 : vector<1x256xf32>
    %321 = vector.broadcast %72 : f32 to vector<1x256xf32>
    %322 = arith.mulf %321, %318 : vector<1x256xf32>
    %323 = arith.addf %320, %322 : vector<1x256xf32>
    %324 = arith.addf %316, %323 : vector<1x256xf32>
    %c0_101 = arith.constant 0 : index
    %c143 = arith.constant 143 : index
    %325 = vector.load %arg6[%c0_101, %c143] : memref<1x512xf32, #tpu.memory_space<vmem>>, vector<1x256xf32>
    %c0_102 = arith.constant 0 : index
    %c143_103 = arith.constant 143 : index
    %326 = vector.load %arg7[%c0_102, %c143_103] : memref<1x512xf32, #tpu.memory_space<vmem>>, vector<1x256xf32>
    %327 = vector.broadcast %30 : f32 to vector<1x256xf32>
    %328 = arith.mulf %327, %325 : vector<1x256xf32>
    %329 = vector.broadcast %79 : f32 to vector<1x256xf32>
    %330 = arith.mulf %329, %326 : vector<1x256xf32>
    %331 = arith.addf %328, %330 : vector<1x256xf32>
    %332 = arith.addf %324, %331 : vector<1x256xf32>
    %c0_104 = arith.constant 0 : index
    %c159 = arith.constant 159 : index
    %333 = vector.load %arg6[%c0_104, %c159] : memref<1x512xf32, #tpu.memory_space<vmem>>, vector<1x256xf32>
    %c0_105 = arith.constant 0 : index
    %c159_106 = arith.constant 159 : index
    %334 = vector.load %arg7[%c0_105, %c159_106] : memref<1x512xf32, #tpu.memory_space<vmem>>, vector<1x256xf32>
    %335 = vector.broadcast %37 : f32 to vector<1x256xf32>
    %336 = arith.mulf %335, %333 : vector<1x256xf32>
    %337 = vector.broadcast %86 : f32 to vector<1x256xf32>
    %338 = arith.mulf %337, %334 : vector<1x256xf32>
    %339 = arith.addf %336, %338 : vector<1x256xf32>
    %340 = arith.addf %332, %339 : vector<1x256xf32>
    %c0_107 = arith.constant 0 : index
    %c175 = arith.constant 175 : index
    %341 = vector.load %arg6[%c0_107, %c175] : memref<1x512xf32, #tpu.memory_space<vmem>>, vector<1x256xf32>
    %c0_108 = arith.constant 0 : index
    %c175_109 = arith.constant 175 : index
    %342 = vector.load %arg7[%c0_108, %c175_109] : memref<1x512xf32, #tpu.memory_space<vmem>>, vector<1x256xf32>
    %343 = vector.broadcast %44 : f32 to vector<1x256xf32>
    %344 = arith.mulf %343, %341 : vector<1x256xf32>
    %345 = vector.broadcast %93 : f32 to vector<1x256xf32>
    %346 = arith.mulf %345, %342 : vector<1x256xf32>
    %347 = arith.addf %344, %346 : vector<1x256xf32>
    %348 = arith.addf %340, %347 : vector<1x256xf32>
    %c1_i32_110 = arith.constant 1 : i32
    %349 = vector.broadcast %c1_i32_110 : i32 to vector<1x256xi32>
    %350 = arith.cmpi sge, %116, %349 : vector<1x256xi32>
    %cst_111 = arith.constant 0.000000e+00 : f32
    %351 = vector.broadcast %cst_111 : f32 to vector<1x256xf32>
    %352 = arith.select %350, %348, %351 : vector<1x256xi1>, vector<1x256xf32>
    %353 = arith.addf %291, %352 : vector<1x256xf32>
    %cst_112 = arith.constant 0.000000e+00 : f32
    %354 = vector.broadcast %cst_112 : f32 to vector<1x256xf32>
    %c0_113 = arith.constant 0 : index
    %c80_114 = arith.constant 80 : index
    %355 = vector.load %arg6[%c0_113, %c80_114] : memref<1x512xf32, #tpu.memory_space<vmem>>, vector<1x256xf32>
    %c0_115 = arith.constant 0 : index
    %c80_116 = arith.constant 80 : index
    %356 = vector.load %arg7[%c0_115, %c80_116] : memref<1x512xf32, #tpu.memory_space<vmem>>, vector<1x256xf32>
    %357 = vector.broadcast %3 : f32 to vector<1x256xf32>
    %358 = arith.mulf %357, %355 : vector<1x256xf32>
    %359 = vector.broadcast %52 : f32 to vector<1x256xf32>
    %360 = arith.mulf %359, %356 : vector<1x256xf32>
    %361 = arith.addf %358, %360 : vector<1x256xf32>
    %362 = arith.addf %354, %361 : vector<1x256xf32>
    %c0_117 = arith.constant 0 : index
    %c96_118 = arith.constant 96 : index
    %363 = vector.load %arg6[%c0_117, %c96_118] : memref<1x512xf32, #tpu.memory_space<vmem>>, vector<1x256xf32>
    %c0_119 = arith.constant 0 : index
    %c96_120 = arith.constant 96 : index
    %364 = vector.load %arg7[%c0_119, %c96_120] : memref<1x512xf32, #tpu.memory_space<vmem>>, vector<1x256xf32>
    %365 = vector.broadcast %10 : f32 to vector<1x256xf32>
    %366 = arith.mulf %365, %363 : vector<1x256xf32>
    %367 = vector.broadcast %59 : f32 to vector<1x256xf32>
    %368 = arith.mulf %367, %364 : vector<1x256xf32>
    %369 = arith.addf %366, %368 : vector<1x256xf32>
    %370 = arith.addf %362, %369 : vector<1x256xf32>
    %c0_121 = arith.constant 0 : index
    %c112 = arith.constant 112 : index
    %371 = vector.load %arg6[%c0_121, %c112] : memref<1x512xf32, #tpu.memory_space<vmem>>, vector<1x256xf32>
    %c0_122 = arith.constant 0 : index
    %c112_123 = arith.constant 112 : index
    %372 = vector.load %arg7[%c0_122, %c112_123] : memref<1x512xf32, #tpu.memory_space<vmem>>, vector<1x256xf32>
    %373 = vector.broadcast %17 : f32 to vector<1x256xf32>
    %374 = arith.mulf %373, %371 : vector<1x256xf32>
    %375 = vector.broadcast %66 : f32 to vector<1x256xf32>
    %376 = arith.mulf %375, %372 : vector<1x256xf32>
    %377 = arith.addf %374, %376 : vector<1x256xf32>
    %378 = arith.addf %370, %377 : vector<1x256xf32>
    %c0_124 = arith.constant 0 : index
    %c128_125 = arith.constant 128 : index
    %379 = vector.load %arg6[%c0_124, %c128_125] : memref<1x512xf32, #tpu.memory_space<vmem>>, vector<1x256xf32>
    %c0_126 = arith.constant 0 : index
    %c128_127 = arith.constant 128 : index
    %380 = vector.load %arg7[%c0_126, %c128_127] : memref<1x512xf32, #tpu.memory_space<vmem>>, vector<1x256xf32>
    %381 = vector.broadcast %24 : f32 to vector<1x256xf32>
    %382 = arith.mulf %381, %379 : vector<1x256xf32>
    %383 = vector.broadcast %73 : f32 to vector<1x256xf32>
    %384 = arith.mulf %383, %380 : vector<1x256xf32>
    %385 = arith.addf %382, %384 : vector<1x256xf32>
    %386 = arith.addf %378, %385 : vector<1x256xf32>
    %c0_128 = arith.constant 0 : index
    %c144 = arith.constant 144 : index
    %387 = vector.load %arg6[%c0_128, %c144] : memref<1x512xf32, #tpu.memory_space<vmem>>, vector<1x256xf32>
    %c0_129 = arith.constant 0 : index
    %c144_130 = arith.constant 144 : index
    %388 = vector.load %arg7[%c0_129, %c144_130] : memref<1x512xf32, #tpu.memory_space<vmem>>, vector<1x256xf32>
    %389 = vector.broadcast %31 : f32 to vector<1x256xf32>
    %390 = arith.mulf %389, %387 : vector<1x256xf32>
    %391 = vector.broadcast %80 : f32 to vector<1x256xf32>
    %392 = arith.mulf %391, %388 : vector<1x256xf32>
    %393 = arith.addf %390, %392 : vector<1x256xf32>
    %394 = arith.addf %386, %393 : vector<1x256xf32>
    %c0_131 = arith.constant 0 : index
    %c160 = arith.constant 160 : index
    %395 = vector.load %arg6[%c0_131, %c160] : memref<1x512xf32, #tpu.memory_space<vmem>>, vector<1x256xf32>
    %c0_132 = arith.constant 0 : index
    %c160_133 = arith.constant 160 : index
    %396 = vector.load %arg7[%c0_132, %c160_133] : memref<1x512xf32, #tpu.memory_space<vmem>>, vector<1x256xf32>
    %397 = vector.broadcast %38 : f32 to vector<1x256xf32>
    %398 = arith.mulf %397, %395 : vector<1x256xf32>
    %399 = vector.broadcast %87 : f32 to vector<1x256xf32>
    %400 = arith.mulf %399, %396 : vector<1x256xf32>
    %401 = arith.addf %398, %400 : vector<1x256xf32>
    %402 = arith.addf %394, %401 : vector<1x256xf32>
    %c0_134 = arith.constant 0 : index
    %c176 = arith.constant 176 : index
    %403 = vector.load %arg6[%c0_134, %c176] : memref<1x512xf32, #tpu.memory_space<vmem>>, vector<1x256xf32>
    %c0_135 = arith.constant 0 : index
    %c176_136 = arith.constant 176 : index
    %404 = vector.load %arg7[%c0_135, %c176_136] : memref<1x512xf32, #tpu.memory_space<vmem>>, vector<1x256xf32>
    %405 = vector.broadcast %45 : f32 to vector<1x256xf32>
    %406 = arith.mulf %405, %403 : vector<1x256xf32>
    %407 = vector.broadcast %94 : f32 to vector<1x256xf32>
    %408 = arith.mulf %407, %404 : vector<1x256xf32>
    %409 = arith.addf %406, %408 : vector<1x256xf32>
    %410 = arith.addf %402, %409 : vector<1x256xf32>
    %411 = arith.addf %353, %410 : vector<1x256xf32>
    %cst_137 = arith.constant 0.000000e+00 : f32
    %412 = vector.broadcast %cst_137 : f32 to vector<1x256xf32>
    %c0_138 = arith.constant 0 : index
    %c81_139 = arith.constant 81 : index
    %413 = vector.load %arg6[%c0_138, %c81_139] : memref<1x512xf32, #tpu.memory_space<vmem>>, vector<1x256xf32>
    %c0_140 = arith.constant 0 : index
    %c81_141 = arith.constant 81 : index
    %414 = vector.load %arg7[%c0_140, %c81_141] : memref<1x512xf32, #tpu.memory_space<vmem>>, vector<1x256xf32>
    %415 = vector.broadcast %4 : f32 to vector<1x256xf32>
    %416 = arith.mulf %415, %413 : vector<1x256xf32>
    %417 = vector.broadcast %53 : f32 to vector<1x256xf32>
    %418 = arith.mulf %417, %414 : vector<1x256xf32>
    %419 = arith.addf %416, %418 : vector<1x256xf32>
    %420 = arith.addf %412, %419 : vector<1x256xf32>
    %c0_142 = arith.constant 0 : index
    %c97_143 = arith.constant 97 : index
    %421 = vector.load %arg6[%c0_142, %c97_143] : memref<1x512xf32, #tpu.memory_space<vmem>>, vector<1x256xf32>
    %c0_144 = arith.constant 0 : index
    %c97_145 = arith.constant 97 : index
    %422 = vector.load %arg7[%c0_144, %c97_145] : memref<1x512xf32, #tpu.memory_space<vmem>>, vector<1x256xf32>
    %423 = vector.broadcast %11 : f32 to vector<1x256xf32>
    %424 = arith.mulf %423, %421 : vector<1x256xf32>
    %425 = vector.broadcast %60 : f32 to vector<1x256xf32>
    %426 = arith.mulf %425, %422 : vector<1x256xf32>
    %427 = arith.addf %424, %426 : vector<1x256xf32>
    %428 = arith.addf %420, %427 : vector<1x256xf32>
    %c0_146 = arith.constant 0 : index
    %c113 = arith.constant 113 : index
    %429 = vector.load %arg6[%c0_146, %c113] : memref<1x512xf32, #tpu.memory_space<vmem>>, vector<1x256xf32>
    %c0_147 = arith.constant 0 : index
    %c113_148 = arith.constant 113 : index
    %430 = vector.load %arg7[%c0_147, %c113_148] : memref<1x512xf32, #tpu.memory_space<vmem>>, vector<1x256xf32>
    %431 = vector.broadcast %18 : f32 to vector<1x256xf32>
    %432 = arith.mulf %431, %429 : vector<1x256xf32>
    %433 = vector.broadcast %67 : f32 to vector<1x256xf32>
    %434 = arith.mulf %433, %430 : vector<1x256xf32>
    %435 = arith.addf %432, %434 : vector<1x256xf32>
    %436 = arith.addf %428, %435 : vector<1x256xf32>
    %c0_149 = arith.constant 0 : index
    %c129 = arith.constant 129 : index
    %437 = vector.load %arg6[%c0_149, %c129] : memref<1x512xf32, #tpu.memory_space<vmem>>, vector<1x256xf32>
    %c0_150 = arith.constant 0 : index
    %c129_151 = arith.constant 129 : index
    %438 = vector.load %arg7[%c0_150, %c129_151] : memref<1x512xf32, #tpu.memory_space<vmem>>, vector<1x256xf32>
    %439 = vector.broadcast %25 : f32 to vector<1x256xf32>
    %440 = arith.mulf %439, %437 : vector<1x256xf32>
    %441 = vector.broadcast %74 : f32 to vector<1x256xf32>
    %442 = arith.mulf %441, %438 : vector<1x256xf32>
    %443 = arith.addf %440, %442 : vector<1x256xf32>
    %444 = arith.addf %436, %443 : vector<1x256xf32>
    %c0_152 = arith.constant 0 : index
    %c145 = arith.constant 145 : index
    %445 = vector.load %arg6[%c0_152, %c145] : memref<1x512xf32, #tpu.memory_space<vmem>>, vector<1x256xf32>
    %c0_153 = arith.constant 0 : index
    %c145_154 = arith.constant 145 : index
    %446 = vector.load %arg7[%c0_153, %c145_154] : memref<1x512xf32, #tpu.memory_space<vmem>>, vector<1x256xf32>
    %447 = vector.broadcast %32 : f32 to vector<1x256xf32>
    %448 = arith.mulf %447, %445 : vector<1x256xf32>
    %449 = vector.broadcast %81 : f32 to vector<1x256xf32>
    %450 = arith.mulf %449, %446 : vector<1x256xf32>
    %451 = arith.addf %448, %450 : vector<1x256xf32>
    %452 = arith.addf %444, %451 : vector<1x256xf32>
    %c0_155 = arith.constant 0 : index
    %c161 = arith.constant 161 : index
    %453 = vector.load %arg6[%c0_155, %c161] : memref<1x512xf32, #tpu.memory_space<vmem>>, vector<1x256xf32>
    %c0_156 = arith.constant 0 : index
    %c161_157 = arith.constant 161 : index
    %454 = vector.load %arg7[%c0_156, %c161_157] : memref<1x512xf32, #tpu.memory_space<vmem>>, vector<1x256xf32>
    %455 = vector.broadcast %39 : f32 to vector<1x256xf32>
    %456 = arith.mulf %455, %453 : vector<1x256xf32>
    %457 = vector.broadcast %88 : f32 to vector<1x256xf32>
    %458 = arith.mulf %457, %454 : vector<1x256xf32>
    %459 = arith.addf %456, %458 : vector<1x256xf32>
    %460 = arith.addf %452, %459 : vector<1x256xf32>
    %c0_158 = arith.constant 0 : index
    %c177 = arith.constant 177 : index
    %461 = vector.load %arg6[%c0_158, %c177] : memref<1x512xf32, #tpu.memory_space<vmem>>, vector<1x256xf32>
    %c0_159 = arith.constant 0 : index
    %c177_160 = arith.constant 177 : index
    %462 = vector.load %arg7[%c0_159, %c177_160] : memref<1x512xf32, #tpu.memory_space<vmem>>, vector<1x256xf32>
    %463 = vector.broadcast %46 : f32 to vector<1x256xf32>
    %464 = arith.mulf %463, %461 : vector<1x256xf32>
    %465 = vector.broadcast %95 : f32 to vector<1x256xf32>
    %466 = arith.mulf %465, %462 : vector<1x256xf32>
    %467 = arith.addf %464, %466 : vector<1x256xf32>
    %468 = arith.addf %460, %467 : vector<1x256xf32>
    %c15_i32 = arith.constant 15 : i32
    %469 = vector.broadcast %c15_i32 : i32 to vector<1x256xi32>
    %470 = arith.cmpi slt, %116, %469 : vector<1x256xi32>
    %cst_161 = arith.constant 0.000000e+00 : f32
    %471 = vector.broadcast %cst_161 : f32 to vector<1x256xf32>
    %472 = arith.select %470, %468, %471 : vector<1x256xi1>, vector<1x256xf32>
    %473 = arith.addf %411, %472 : vector<1x256xf32>
    %cst_162 = arith.constant 0.000000e+00 : f32
    %474 = vector.broadcast %cst_162 : f32 to vector<1x256xf32>
    %c0_163 = arith.constant 0 : index
    %c82_164 = arith.constant 82 : index
    %475 = vector.load %arg6[%c0_163, %c82_164] : memref<1x512xf32, #tpu.memory_space<vmem>>, vector<1x256xf32>
    %c0_165 = arith.constant 0 : index
    %c82_166 = arith.constant 82 : index
    %476 = vector.load %arg7[%c0_165, %c82_166] : memref<1x512xf32, #tpu.memory_space<vmem>>, vector<1x256xf32>
    %477 = vector.broadcast %5 : f32 to vector<1x256xf32>
    %478 = arith.mulf %477, %475 : vector<1x256xf32>
    %479 = vector.broadcast %54 : f32 to vector<1x256xf32>
    %480 = arith.mulf %479, %476 : vector<1x256xf32>
    %481 = arith.addf %478, %480 : vector<1x256xf32>
    %482 = arith.addf %474, %481 : vector<1x256xf32>
    %c0_167 = arith.constant 0 : index
    %c98 = arith.constant 98 : index
    %483 = vector.load %arg6[%c0_167, %c98] : memref<1x512xf32, #tpu.memory_space<vmem>>, vector<1x256xf32>
    %c0_168 = arith.constant 0 : index
    %c98_169 = arith.constant 98 : index
    %484 = vector.load %arg7[%c0_168, %c98_169] : memref<1x512xf32, #tpu.memory_space<vmem>>, vector<1x256xf32>
    %485 = vector.broadcast %12 : f32 to vector<1x256xf32>
    %486 = arith.mulf %485, %483 : vector<1x256xf32>
    %487 = vector.broadcast %61 : f32 to vector<1x256xf32>
    %488 = arith.mulf %487, %484 : vector<1x256xf32>
    %489 = arith.addf %486, %488 : vector<1x256xf32>
    %490 = arith.addf %482, %489 : vector<1x256xf32>
    %c0_170 = arith.constant 0 : index
    %c114 = arith.constant 114 : index
    %491 = vector.load %arg6[%c0_170, %c114] : memref<1x512xf32, #tpu.memory_space<vmem>>, vector<1x256xf32>
    %c0_171 = arith.constant 0 : index
    %c114_172 = arith.constant 114 : index
    %492 = vector.load %arg7[%c0_171, %c114_172] : memref<1x512xf32, #tpu.memory_space<vmem>>, vector<1x256xf32>
    %493 = vector.broadcast %19 : f32 to vector<1x256xf32>
    %494 = arith.mulf %493, %491 : vector<1x256xf32>
    %495 = vector.broadcast %68 : f32 to vector<1x256xf32>
    %496 = arith.mulf %495, %492 : vector<1x256xf32>
    %497 = arith.addf %494, %496 : vector<1x256xf32>
    %498 = arith.addf %490, %497 : vector<1x256xf32>
    %c0_173 = arith.constant 0 : index
    %c130 = arith.constant 130 : index
    %499 = vector.load %arg6[%c0_173, %c130] : memref<1x512xf32, #tpu.memory_space<vmem>>, vector<1x256xf32>
    %c0_174 = arith.constant 0 : index
    %c130_175 = arith.constant 130 : index
    %500 = vector.load %arg7[%c0_174, %c130_175] : memref<1x512xf32, #tpu.memory_space<vmem>>, vector<1x256xf32>
    %501 = vector.broadcast %26 : f32 to vector<1x256xf32>
    %502 = arith.mulf %501, %499 : vector<1x256xf32>
    %503 = vector.broadcast %75 : f32 to vector<1x256xf32>
    %504 = arith.mulf %503, %500 : vector<1x256xf32>
    %505 = arith.addf %502, %504 : vector<1x256xf32>
    %506 = arith.addf %498, %505 : vector<1x256xf32>
    %c0_176 = arith.constant 0 : index
    %c146 = arith.constant 146 : index
    %507 = vector.load %arg6[%c0_176, %c146] : memref<1x512xf32, #tpu.memory_space<vmem>>, vector<1x256xf32>
    %c0_177 = arith.constant 0 : index
    %c146_178 = arith.constant 146 : index
    %508 = vector.load %arg7[%c0_177, %c146_178] : memref<1x512xf32, #tpu.memory_space<vmem>>, vector<1x256xf32>
    %509 = vector.broadcast %33 : f32 to vector<1x256xf32>
    %510 = arith.mulf %509, %507 : vector<1x256xf32>
    %511 = vector.broadcast %82 : f32 to vector<1x256xf32>
    %512 = arith.mulf %511, %508 : vector<1x256xf32>
    %513 = arith.addf %510, %512 : vector<1x256xf32>
    %514 = arith.addf %506, %513 : vector<1x256xf32>
    %c0_179 = arith.constant 0 : index
    %c162 = arith.constant 162 : index
    %515 = vector.load %arg6[%c0_179, %c162] : memref<1x512xf32, #tpu.memory_space<vmem>>, vector<1x256xf32>
    %c0_180 = arith.constant 0 : index
    %c162_181 = arith.constant 162 : index
    %516 = vector.load %arg7[%c0_180, %c162_181] : memref<1x512xf32, #tpu.memory_space<vmem>>, vector<1x256xf32>
    %517 = vector.broadcast %40 : f32 to vector<1x256xf32>
    %518 = arith.mulf %517, %515 : vector<1x256xf32>
    %519 = vector.broadcast %89 : f32 to vector<1x256xf32>
    %520 = arith.mulf %519, %516 : vector<1x256xf32>
    %521 = arith.addf %518, %520 : vector<1x256xf32>
    %522 = arith.addf %514, %521 : vector<1x256xf32>
    %c0_182 = arith.constant 0 : index
    %c178 = arith.constant 178 : index
    %523 = vector.load %arg6[%c0_182, %c178] : memref<1x512xf32, #tpu.memory_space<vmem>>, vector<1x256xf32>
    %c0_183 = arith.constant 0 : index
    %c178_184 = arith.constant 178 : index
    %524 = vector.load %arg7[%c0_183, %c178_184] : memref<1x512xf32, #tpu.memory_space<vmem>>, vector<1x256xf32>
    %525 = vector.broadcast %47 : f32 to vector<1x256xf32>
    %526 = arith.mulf %525, %523 : vector<1x256xf32>
    %527 = vector.broadcast %96 : f32 to vector<1x256xf32>
    %528 = arith.mulf %527, %524 : vector<1x256xf32>
    %529 = arith.addf %526, %528 : vector<1x256xf32>
    %530 = arith.addf %522, %529 : vector<1x256xf32>
    %c14_i32 = arith.constant 14 : i32
    %531 = vector.broadcast %c14_i32 : i32 to vector<1x256xi32>
    %532 = arith.cmpi slt, %116, %531 : vector<1x256xi32>
    %cst_185 = arith.constant 0.000000e+00 : f32
    %533 = vector.broadcast %cst_185 : f32 to vector<1x256xf32>
    %534 = arith.select %532, %530, %533 : vector<1x256xi1>, vector<1x256xf32>
    %535 = arith.addf %473, %534 : vector<1x256xf32>
    %cst_186 = arith.constant 0.000000e+00 : f32
    %536 = vector.broadcast %cst_186 : f32 to vector<1x256xf32>
    %c0_187 = arith.constant 0 : index
    %c83_188 = arith.constant 83 : index
    %537 = vector.load %arg6[%c0_187, %c83_188] : memref<1x512xf32, #tpu.memory_space<vmem>>, vector<1x256xf32>
    %c0_189 = arith.constant 0 : index
    %c83_190 = arith.constant 83 : index
    %538 = vector.load %arg7[%c0_189, %c83_190] : memref<1x512xf32, #tpu.memory_space<vmem>>, vector<1x256xf32>
    %539 = vector.broadcast %6 : f32 to vector<1x256xf32>
    %540 = arith.mulf %539, %537 : vector<1x256xf32>
    %541 = vector.broadcast %55 : f32 to vector<1x256xf32>
    %542 = arith.mulf %541, %538 : vector<1x256xf32>
    %543 = arith.addf %540, %542 : vector<1x256xf32>
    %544 = arith.addf %536, %543 : vector<1x256xf32>
    %c0_191 = arith.constant 0 : index
    %c99 = arith.constant 99 : index
    %545 = vector.load %arg6[%c0_191, %c99] : memref<1x512xf32, #tpu.memory_space<vmem>>, vector<1x256xf32>
    %c0_192 = arith.constant 0 : index
    %c99_193 = arith.constant 99 : index
    %546 = vector.load %arg7[%c0_192, %c99_193] : memref<1x512xf32, #tpu.memory_space<vmem>>, vector<1x256xf32>
    %547 = vector.broadcast %13 : f32 to vector<1x256xf32>
    %548 = arith.mulf %547, %545 : vector<1x256xf32>
    %549 = vector.broadcast %62 : f32 to vector<1x256xf32>
    %550 = arith.mulf %549, %546 : vector<1x256xf32>
    %551 = arith.addf %548, %550 : vector<1x256xf32>
    %552 = arith.addf %544, %551 : vector<1x256xf32>
    %c0_194 = arith.constant 0 : index
    %c115 = arith.constant 115 : index
    %553 = vector.load %arg6[%c0_194, %c115] : memref<1x512xf32, #tpu.memory_space<vmem>>, vector<1x256xf32>
    %c0_195 = arith.constant 0 : index
    %c115_196 = arith.constant 115 : index
    %554 = vector.load %arg7[%c0_195, %c115_196] : memref<1x512xf32, #tpu.memory_space<vmem>>, vector<1x256xf32>
    %555 = vector.broadcast %20 : f32 to vector<1x256xf32>
    %556 = arith.mulf %555, %553 : vector<1x256xf32>
    %557 = vector.broadcast %69 : f32 to vector<1x256xf32>
    %558 = arith.mulf %557, %554 : vector<1x256xf32>
    %559 = arith.addf %556, %558 : vector<1x256xf32>
    %560 = arith.addf %552, %559 : vector<1x256xf32>
    %c0_197 = arith.constant 0 : index
    %c131 = arith.constant 131 : index
    %561 = vector.load %arg6[%c0_197, %c131] : memref<1x512xf32, #tpu.memory_space<vmem>>, vector<1x256xf32>
    %c0_198 = arith.constant 0 : index
    %c131_199 = arith.constant 131 : index
    %562 = vector.load %arg7[%c0_198, %c131_199] : memref<1x512xf32, #tpu.memory_space<vmem>>, vector<1x256xf32>
    %563 = vector.broadcast %27 : f32 to vector<1x256xf32>
    %564 = arith.mulf %563, %561 : vector<1x256xf32>
    %565 = vector.broadcast %76 : f32 to vector<1x256xf32>
    %566 = arith.mulf %565, %562 : vector<1x256xf32>
    %567 = arith.addf %564, %566 : vector<1x256xf32>
    %568 = arith.addf %560, %567 : vector<1x256xf32>
    %c0_200 = arith.constant 0 : index
    %c147 = arith.constant 147 : index
    %569 = vector.load %arg6[%c0_200, %c147] : memref<1x512xf32, #tpu.memory_space<vmem>>, vector<1x256xf32>
    %c0_201 = arith.constant 0 : index
    %c147_202 = arith.constant 147 : index
    %570 = vector.load %arg7[%c0_201, %c147_202] : memref<1x512xf32, #tpu.memory_space<vmem>>, vector<1x256xf32>
    %571 = vector.broadcast %34 : f32 to vector<1x256xf32>
    %572 = arith.mulf %571, %569 : vector<1x256xf32>
    %573 = vector.broadcast %83 : f32 to vector<1x256xf32>
    %574 = arith.mulf %573, %570 : vector<1x256xf32>
    %575 = arith.addf %572, %574 : vector<1x256xf32>
    %576 = arith.addf %568, %575 : vector<1x256xf32>
    %c0_203 = arith.constant 0 : index
    %c163 = arith.constant 163 : index
    %577 = vector.load %arg6[%c0_203, %c163] : memref<1x512xf32, #tpu.memory_space<vmem>>, vector<1x256xf32>
    %c0_204 = arith.constant 0 : index
    %c163_205 = arith.constant 163 : index
    %578 = vector.load %arg7[%c0_204, %c163_205] : memref<1x512xf32, #tpu.memory_space<vmem>>, vector<1x256xf32>
    %579 = vector.broadcast %41 : f32 to vector<1x256xf32>
    %580 = arith.mulf %579, %577 : vector<1x256xf32>
    %581 = vector.broadcast %90 : f32 to vector<1x256xf32>
    %582 = arith.mulf %581, %578 : vector<1x256xf32>
    %583 = arith.addf %580, %582 : vector<1x256xf32>
    %584 = arith.addf %576, %583 : vector<1x256xf32>
    %c0_206 = arith.constant 0 : index
    %c179 = arith.constant 179 : index
    %585 = vector.load %arg6[%c0_206, %c179] : memref<1x512xf32, #tpu.memory_space<vmem>>, vector<1x256xf32>
    %c0_207 = arith.constant 0 : index
    %c179_208 = arith.constant 179 : index
    %586 = vector.load %arg7[%c0_207, %c179_208] : memref<1x512xf32, #tpu.memory_space<vmem>>, vector<1x256xf32>
    %587 = vector.broadcast %48 : f32 to vector<1x256xf32>
    %588 = arith.mulf %587, %585 : vector<1x256xf32>
    %589 = vector.broadcast %97 : f32 to vector<1x256xf32>
    %590 = arith.mulf %589, %586 : vector<1x256xf32>
    %591 = arith.addf %588, %590 : vector<1x256xf32>
    %592 = arith.addf %584, %591 : vector<1x256xf32>
    %c13_i32 = arith.constant 13 : i32
    %593 = vector.broadcast %c13_i32 : i32 to vector<1x256xi32>
    %594 = arith.cmpi slt, %116, %593 : vector<1x256xi32>
    %cst_209 = arith.constant 0.000000e+00 : f32
    %595 = vector.broadcast %cst_209 : f32 to vector<1x256xf32>
    %596 = arith.select %594, %592, %595 : vector<1x256xi1>, vector<1x256xf32>
    %597 = arith.addf %535, %596 : vector<1x256xf32>
    %598 = arith.negf %597 : vector<1x256xf32>
    %599 = math.exp %598 : vector<1x256xf32>
    %cst_210 = arith.constant 1.000000e+00 : f32
    %600 = vector.broadcast %cst_210 : f32 to vector<1x256xf32>
    %601 = arith.addf %600, %599 : vector<1x256xf32>
    %602 = arith.divf %600, %601 : vector<1x256xf32>
    %c0_211 = arith.constant 0 : index
    %c128_212 = arith.constant 128 : index
    %603 = vector.load %arg6[%c0_211, %c128_212] : memref<1x512xf32, #tpu.memory_space<vmem>>, vector<1x256xf32>
    tpu.vector_store %arg6[%c0_211, %c128_212], %602 {strides = array<i32>} : memref<1x512xf32, #tpu.memory_space<vmem>>, vector<1x256xf32>,
    %c0_213 = arith.constant 0 : index
    %c0_214 = arith.constant 0 : index
    %c0_215 = arith.constant 0 : index
    %604 = vector.load %arg4[%c0_213, %c0_214, %c0_215] : memref<1x32x256xf32, #tpu.memory_space<vmem>>, vector<1x32x256xf32>
    %605 = vector.shape_cast %604 : vector<1x32x256xf32> to vector<32x256xf32>
    %c0_216 = arith.constant 0 : index
    %c0_217 = arith.constant 0 : index
    %606 = vector.load %arg8[%c0_216, %c0_217] : memref<32x1xf32, #tpu.memory_space<vmem>>, vector<32x1xf32>
    %c0_218 = arith.constant 0 : index
    %c128_219 = arith.constant 128 : index
    %607 = vector.load %arg6[%c0_218, %c128_219] : memref<1x512xf32, #tpu.memory_space<vmem>>, vector<1x256xf32>
    %608 = vector.broadcast %606 : vector<32x1xf32> to vector<32x256xf32>
    %609 = arith.mulf %605, %608 : vector<32x256xf32>
    %610 = vector.broadcast %607 : vector<1x256xf32> to vector<32x256xf32>
    %611 = arith.mulf %609, %610 : vector<32x256xf32>
    %c0_220 = arith.constant 0 : index
    %c0_221 = arith.constant 0 : index
    %c0_222 = arith.constant 0 : index
    %612 = vector.load %arg5[%c0_220, %c0_221, %c0_222] : memref<1x32x256xf32, #tpu.memory_space<vmem>>, vector<1x32x256xf32>
    %613 = vector.shape_cast %612 : vector<1x32x256xf32> to vector<32x256xf32>
    %614 = vector.shape_cast %611 : vector<32x256xf32> to vector<1x32x256xf32>
    tpu.vector_store %arg5[%c0_220, %c0_221, %c0_222], %614 {strides = array<i32>} : memref<1x32x256xf32, #tpu.memory_space<vmem>>, vector<1x32x256xf32>,
    return
  }
  func.func @transform_0(%arg0: i32) -> i32 {
    %c0_i32 = arith.constant 0 : i32
    %c0_i32_0 = arith.constant 0 : i32
    return %c0_i32 : i32
  }
  func.func @transform_1(%arg0: i32) -> (i32, i32) {
    %c0_i32 = arith.constant 0 : i32
    %c0_i32_0 = arith.constant 0 : i32
    %c0_i32_1 = arith.constant 0 : i32
    return %c0_i32, %c0_i32_0 : i32, i32
  }
  func.func @transform_2(%arg0: i32) -> (i32, i32) {
    %c0_i32 = arith.constant 0 : i32
    %c0_i32_0 = arith.constant 0 : i32
    %c0_i32_1 = arith.constant 0 : i32
    return %c0_i32, %c0_i32_0 : i32, i32
  }
  func.func @transform_3(%arg0: i32) -> (i32, i32, i32) {
    %c0_i32 = arith.constant 0 : i32
    %c0_i32_0 = arith.constant 0 : i32
    %c0_i32_1 = arith.constant 0 : i32
    return %arg0, %c0_i32, %c0_i32_0 : i32, i32, i32
  }
  func.func @transform_4(%arg0: i32) -> (i32, i32, i32) {
    %c0_i32 = arith.constant 0 : i32
    %c0_i32_0 = arith.constant 0 : i32
    %c0_i32_1 = arith.constant 0 : i32
    return %arg0, %c0_i32, %c0_i32_0 : i32, i32, i32
  }
}

</mosaic_0001>

<bundles_post_ra>
// kernel: tpu_custom_call.1
= control target key start
LH: loop header
LB: loop body
LE: loop exit
PB: predicated region body
PF: predicated region fallthrough
CT: control target
= control target key end

     0   :  { %s2668_s0 = inlined_call_operand.vmem [shape: f32[98], index: 0, kind: input, shape index: {}]   ;;  %s2669_s1 = inlined_call_operand.vmem [shape: f32[32,2], index: 1, kind: input, shape index: {}]   ;;  %s2670_s2 = inlined_call_operand.vmem [shape: f32[32,2], index: 2, kind: input, shape index: {}]   ;;  %s2671_s3 = inlined_call_operand.hbm [shape: f32[2,32,256], index: 3, kind: input, shape index: {}]   ;;  %s2672_s4 = inlined_call_operand.hbm [shape: f32[2,32,256], index: 4, kind: output, shape index: {}]  }
   0x1   :  { %2680 = sst [smem:[#allocation14_spill]] %s2668_s0 }
   0x2   :  { %9 = vsyncpa [#allocation8], 0 }
   0x3   :  { %10 = vsyncpa [#allocation6], 0 }
   0x4   :  { %12 = vsyncpa [#allocation6 + $0x1], 0 }
   0x5   :  { %13 = vsyncpa [#allocation7], 0 }
   0x6   :  { %15 = vsyncpa [#allocation7 + $0x1], 0  ;;  %s1939_s15 = smov 0   ;;  %s1941_s16 = smov 0  }
   0x7   :  { %s1943_s17 = smov 0   ;;  %s1945_s18 = smov 0  }
   0x8 LB: > { %s1960_s19 = sadd.s32 4294967295, %s1891_s18   ;;  %s1545_s20 = sadd.s32 4294967294, %s1891_s18   ;;  %s1891_s18 = sphi %s1945_s18, %s2698_s18   ;;  %s1887_s17 = sphi %s1943_s17, %s2697_s17   ;;  %s1883_s16 = sphi %s1941_s16, %s2696_s16   ;;  %s1879_s15 = sphi %s1939_s15, %s2695_s15  }
   0x9   : > { %s1964_s21 = sadd.s32 1, %s1891_s18   ;;  %s91_s22 = sadd.s32 1, %s1887_s17 }
   0xa   : > { %s88_s23 = ssub.s32 %s1891_s18, %s1964_s21  ;;  %p98_p0 = scmp.ne.s32.totalorder %s1887_s17, %s1883_s16 }
   0xb   : > { %p89_p1 = scmp.eq.s32.totalorder %s88_s23, 0  ;;  %p99_p2 = scmp.eq.s32.totalorder %s1891_s18, 0 }
   0xc   : > { %p104_p3 = scmp.ne.s32.totalorder %s1883_s16, %s1879_s15  ;;  %p105_p4 = scmp.eq.s32.totalorder %s1960_s19, 0 }
   0xd   : > { %s1976_s24 = scalar_select %p89_p1, %s1887_s17, %s91_s22  }
   0xe   : > { %p1978_p5 = por %p99_p2, %p98_p0  ;;  %p1984_p6 = por %p105_p4, %p104_p3 }
   0xf   : > { %p128_p7 = scmp.eq.s32.totalorder %s1960_s19, 1  ;;  %p134_p8 = scmp.eq.s32.totalorder %s1545_s20, 1 }
  0x10   : > { %p1546_p9 = scmp.ge.s32.totalorder %s1891_s18, 1  ;;  %p141_p10 = scmp.lt.s32.totalorder %s1891_s18, 3 }
  0x11   : > { %p1991_p11 = por %p128_p7, %p98_p0  ;;  %p1995_p12 = por %p134_p8, %p104_p3 }
  0x12   : > { %p1999_p13 = pnand %p1546_p9, %p141_p10  ;;  %s2686_s0 = sld [smem:[#allocation14_spill]] }
  0x13   : > { %p1687_p2 = scmp.lt.s32.totalorder %s1891_s18, 2  ;;  %s170_s7 = sand.u32 1, %s1887_s17  }
  0x14   : > { %p1674_p1 = pneg %p1999_p13  ;;  %s1549_s9 = sshll.u32 %s170_s7, 6 }
  0x15   : > { %p2015_p3 = pnand %p1687_p2, %p1978_p5  ;;  %s1893_s10 = smov [#allocation5]  }
  0x16   : > { %p1675_p7 = pnand %p1674_p1, %p105_p4  ;;  %s1664_s11 = sshll.u32 %s1891_s18, 6 }
  0x17   : > { %s174_s12 = scalar_lea.vmem [#allocation9], %s1549_s9  ;;  %s179_s22 = scalar_lea.hbm %s2671_s3, %s1664_s11 }
  0x18   : > { %s153_s6 = sshll.u32 %s2686_s0, 4  ;;  %s182_s13 = sshll.u32 %s174_s12, 4  ;;  %s154_s6 = int_to_ptr.vmem [resolvable:$true] %s153_s6  ;;  %s183_s13 = int_to_ptr.vmem [resolvable:$true] %s182_s13 }
  0x19   : > { %1677 = dma.vmem_to_smem (!%p1675_p7), %s154_s6, 16, %s1893_s10, [#allocation8]  }
  0x1a   : > { %s180_s23 = sshll.u32 %s179_s22, 4  ;;  %s171_s30 = scalar_lea.sflag [#allocation6], %s170_s7  ;;  %s181_s23 = int_to_ptr.hbm [resolvable:$true] %s180_s23 }
  0x1b   : > { %s1791_s25 = sshra.s32 %s181_s23, 4  ;;  %p1795_p8 = pneg %p2015_p3  ;;  %s1792_s25 = int_to_ptr.hbm [resolvable:$true] %s1791_s25 }
  0x1c   : > { %s1793_s5 = scalar_lea.hbm %s1792_s25, 64  ;;  %s1798_s9 = scalar_lea.hbm %s2671_s3, 128 }
  0x1d   : > { %p1794_p5 = scmp.ne.s32.totalorder %s1792_s25, %s1793_s5  ;;  %p1799_p1 = scmp.lt.s32.totalorder %s1792_s25, %s2671_s3 }
  0x1e   : > { %p1800_p2 = scmp.lt.s32.totalorder %s1798_s9, %s1793_s5 }
  0x1f   : > { %p1796_p9 = pnand %p1795_p8, %p1794_p5 }
  0x20   : > { %p1801_p7 = por %p1800_p2, %p1799_p1 }
  0x21   : > { %p1797_p10 = pneg %p1796_p9 }
  0x23   : > { %p1802_p0 = pnand %p1801_p7, %p1797_p10 }
  0x25   : > { %1805 = shalt.err (!%p1802_p0)
}
  0x26   : > { %s1894_s7 = smov 256   ;;  %s1895_s11 = smov 16  }
  0x27   : > { %1681 = dma.hbm_to_vmem [thread:$0]  (!%p2015_p3), %s181_s23, 1024, %s183_s13, %s171_s30, %s1894_s7, %s1894_s7, %s1895_s11  }
  0x28   : > { %194 = sbr.rel (%p1999_p13) target bundleno = 817 (0x331), region = 36 }
  0x2d   : > { %1866 = dma.done.wait (%p105_p4), [#allocation8], 16  }
  0x2e   : > { %1868 = vsyncadd (%p105_p4), [#allocation8], 4294967280  ;;  %s2040_s0 = sand.u32 1, %s1883_s16  }
  0x2f   : > { %s2673_s14 = sshll.u32 %s2040_s0, 6  ;;  %s202_s20 = scalar_lea.sflag [#allocation6], %s2040_s0 }
  0x30   : > { %s2046_s8 = scalar_lea.vmem [#allocation9], %s2673_s14 }
  0x31   : > { %1870 = dma.done.wait (%p1984_p6), %s202_s20, 1024  }
  0x32   : > { %1872 = vsyncadd (%p1984_p6), %s202_s20, 4294966272 }
  0x33   : > { %211 = sfence }
  0x34   : > { %v2053_v0 = vld [vmem:[%s2046_s8] sm:$0xff]  ;;  %v2056_v1 = vld [vmem:[%s2046_s8 + $0x8] sm:$0xff]  ;;  %v2067_v5 = vld [vmem:[%s2046_s8 + $0x10] sm:$0xff]  ;;  %v1896_v16 = vmov 256.0   ;;  %vm420_vm1 = vcmask 15360   ;;  %vm565_vm5 = vcmask 7168  }
  0x35   : > { %v2059_v2 = vld [vmem:[%s2046_s8 + $0x20] sm:$0xff]  ;;  %v381_v3 = vadd.f32 %v2056_v1, %v2053_v0  ;;  %v2064_v4 = vld [vmem:[%s2046_s8 + $0x28] sm:$0xff]  ;;  %v2070_v6 = vld [vmem:[%s2046_s8 + $0x18] sm:$0xff]  ;;  %v404_v12 = vmax.f32 %v2053_v0, %v2056_v1  ;;  %1746 = vrcp.f32 %v1896_v16  ;;  %s2152_s29 = sld [smem:[#allocation5 + $0x46]]  ;;  %s2674_s14 = smov 48  }
  0x36   : > { %v387_v7 = vadd.f32 %v2064_v4, %v2059_v2  ;;  %v407_v8 = vmax.f32 %v2067_v5, %v2070_v6  ;;  %v2077_v9 = vld [vmem:[%s2046_s8 + $0x30] sm:$0xff]  ;;  %v2080_v10 = vld [vmem:[%s2046_s8 + $0x38] sm:$0xff]  ;;  %v384_v11 = vadd.f32 %v2070_v6, %v2067_v5  ;;  %v410_v14 = vmax.f32 %v2059_v2, %v2064_v4  ;;  %v331_v29 = vld [vmem:[%s2669_s1 + $0x8] sm:$0xff]  ;;  %s2154_s13 = sld [smem:[#allocation5 + $0x3f]] }
  0x37   : > { %382 = vadd.xlane.f32.xlu0 %v381_v3  ;;  %v390_v13 = vadd.f32 %v2080_v10, %v2077_v9  ;;  %v413_v15 = vmax.f32 %v2077_v9, %v2080_v10  ;;  %v330_v27 = vld [vmem:[%s2669_s1] sm:$0xff]  ;;  %v332_v31 = vld [vmem:[%s2669_s1 + $0x10] sm:$0xff]  ;;  %v333_v36 = vld [vmem:[%s2669_s1 + $0x18] sm:$0xff]  ;;  %s1576_s22 = sld [smem:[#allocation5 + $0x15]] }
  0x38   : > { %388 = vadd.xlane.f32.xlu1 %v387_v7  ;;  %408 = vmax.xlane.f32.xlu2 %v407_v8  ;;  %s1569_s23 = sld [smem:[#allocation5 + $0xe]] }
  0x39   : > { %s1562_s30 = sld [smem:[#allocation5 + $0x7]] }
  0x3a   : > { %s1611_s25 = sld [smem:[#allocation5 + $0x38]] }
  0x3b   : > { %v1747_v17 = vpop.eup %1746  ;;  %s2167_s5 = sld [smem:[#allocation5 + $0x2a]] }
  0x3c   : > { %v394_v18 = vmul.f32 256.0, %v1747_v17  ;;  %vm398_vm0 = vweird.f32 %v1747_v17  ;;  %s2169_s6 = sld [smem:[#allocation5 + $0x5b]] }
  0x3d   : > { %s2171_s10 = sld [smem:[#allocation5 + $0x1c]] }
  0x3e   : > { %v395_v19 = vsub.f32 1.0, %v394_v18  ;;  %v337_v18 = vld [vmem:[%s2670_s2 + $0x18] sm:$0xff]  ;;  %s2173_s9 = sld [smem:[#allocation5 + $0x23]] }
  0x3f   : > { %385 = vadd.xlane.f32.xlu0 %v384_v11  ;;  %s2177_s12 = sld [smem:[#allocation5 + $0x4d]] }
  0x40   : > { %405 = vmax.xlane.f32.xlu1 %v404_v12  ;;  %391 = vadd.xlane.f32.xlu2 %v390_v13  ;;  %v396_v20 = vmul.f32 %v1747_v17, %v395_v19  ;;  %v335_v19 = vld [vmem:[%s2670_s2 + $0x8] sm:$0xff]  ;;  %s2181_s7 = sld [smem:[#allocation5 + $0x54]] }
  0x41   : > { %s2191_s11 = sld [smem:[#allocation5 + $0x16]] }
  0x42   : > { %v397_v21 = vadd.f32 %v1747_v17, %v396_v20  ;;  %v334_v20 = vld [vmem:[%s2670_s2] sm:$0xff]  ;;  %s2193_s20 = sld [smem:[#allocation5 + $0x47]] }
  0x43   : > { %s2199_s26 = sld [smem:[#allocation5 + $0x8]] }
  0x44   : > { %v399_v25 = vsel %vm398_vm0, %v1747_v17, %v397_v21 }
  0x47   : > { %411 = vmax.xlane.f32.xlu0 %v410_v14 }
  0x48   : > { %414 = vmax.xlane.f32.xlu1 %v413_v15 }
  0xaa   : > { %v383_v22 = vpop.xlane.xlu0 %382 }
  0xab   : > { %v389_v23 = vpop.xlane.xlu1 %388  ;;  %v409_v24 = vpop.xlane.xlu2 %408  ;;  %v400_v26 = vmul.f32 %v399_v25, %v383_v22 }
  0xac   : > { %v402_v28 = vmul.f32 %v399_v25, %v389_v23  ;;  %v452_v38 = vmul.f32 %v409_v24, %v331_v29 }
  0xad   : > { %v416_v34 = vmul.f32 %v400_v26, %v330_v27 }
  0xae   : > { %v418_v41 = vmul.f32 %v402_v28, %v332_v31  ;;  %v456_v46 = vsel %vm420_vm1, %v452_v38, 0.0  ;;  %v336_v28 = vld [vmem:[%s2670_s2 + $0x10] sm:$0xff] }
  0xaf   : > { %v421_v44 = vsel %vm420_vm1, %v416_v34, 0.0 }
  0xb0   : > { %v424_v48 = vsel %vm420_vm1, %v418_v41, 0.0 }
  0xb2   : > { %v386_v30 = vpop.xlane.xlu0 %385 }
  0xb3   : > { %v401_v32 = vmul.f32 %v399_v25, %v386_v30  ;;  %v406_v33 = vpop.xlane.xlu1 %405  ;;  %v392_v35 = vpop.xlane.xlu2 %391 }
  0xb4   : > { %v403_v37 = vmul.f32 %v399_v25, %v392_v35  ;;  %v451_v40 = vmul.f32 %v406_v33, %v330_v27 }
  0xb5   : > { %v417_v39 = vmul.f32 %v401_v32, %v331_v29 }
  0xb6   : > { %v419_v42 = vmul.f32 %v403_v37, %v333_v36  ;;  %v455_v47 = vsel %vm420_vm1, %v451_v40, 0.0 }
  0xb7   : > { %v422_v43 = vsel %vm420_vm1, %v417_v39, 0.0  ;;  %v457_v54 = vadd.f32 %v456_v46, %v455_v47 }
  0xb8   : > { %v423_v45 = vadd.f32 %v422_v43, %v421_v44  ;;  %v426_v49 = vsel %vm420_vm1, %v419_v42, 0.0 }
  0xba   : > { %v412_v50 = vpop.xlane.xlu0 %411  ;;  %v425_v51 = vadd.f32 %v424_v48, %v423_v45 }
  0xbb   : > { %v453_v52 = vmul.f32 %v412_v50, %v332_v31  ;;  %v415_v53 = vpop.xlane.xlu1 %414 }
  0xbc   : > { %v427_v55 = vadd.f32 %v426_v49, %v425_v51  ;;  %v454_v56 = vmul.f32 %v415_v53, %v333_v36 }
  0xbd   : > { %v458_v57 = vsel %vm420_vm1, %v453_v52, 0.0  ;;  %v338_v52 = vlaneseq }
  0xbe   : > { %v459_v58 = vadd.f32 %v458_v57, %v457_v54  ;;  %v428_v59 = vrot.slane %v427_v55, 4  ;;  %v460_v60 = vsel %vm420_vm1, %v454_v56, 0.0 }
  0xbf   : > { %vm367_vm2 = vcmp.lt.s32.totalorder %v338_v52, 128 }
  0xc0   : > { %v429_v61 = vadd.f32 %v428_v59, %v427_v55  ;;  %v461_v62 = vadd.f32 %v460_v60, %v459_v58  ;;  %v1897_v58 = vmov 0.0  }
  0xc1   : > { %369 = vst.msk [vmem:[#allocation2] sm:$0x1] %vm367_vm2, %v1897_v58 }
  0xc2   : > { %v430_v63 = vrot.slane %v429_v61, 2  ;;  %v462_v3 = vrot.slane %v461_v62, 4  ;;  %370 = vst.msk [vmem:[#allocation2 + $0x3] sm:$0x1] %vm367_vm2, %v1897_v58 }
  0xc3   : > { %371 = vst.msk [vmem:[#allocation3] sm:$0x1] %vm367_vm2, %v1897_v58 }
  0xc4   : > { %v463_v7 = vadd.f32 %v462_v3, %v461_v62  ;;  %v431_v8 = vadd.f32 %v430_v63, %v429_v61  ;;  %372 = vst.msk [vmem:[#allocation3 + $0x3] sm:$0x1] %vm367_vm2, %v1897_v58 }
  0xc6   : > { %v464_v11 = vrot.slane %v463_v7, 2  ;;  %v432_v13 = vrot.slane %v431_v8, 1 }
  0xc8   : > { %v465_v12 = vadd.f32 %v464_v11, %v463_v7  ;;  %v433_v17 = vadd.f32 %v432_v13, %v431_v8 }
  0xca   : > { %v466_v14 = vrot.slane %v465_v12, 1  ;;  %v434_v27 = vmax.f32 %v433_v17, 0.0 }
  0xcc   : > { %v467_v15 = vadd.f32 %v466_v14, %v465_v12  ;;  %v436_v29 = vmul.f32 %v434_v27, %v335_v19  ;;  %v435_v30 = vmul.f32 %v434_v27, %v334_v20  ;;  %v437_v35 = vmul.f32 %v434_v27, %v336_v28 }
  0xcd   : > { %v438_v36 = vmul.f32 %v434_v27, %v337_v18 }
  0xce   : > { %v468_v16 = vmax.f32 %v467_v15, 0.0  ;;  %v442_v32 = vsel %vm420_vm1, %v436_v29, 0.0  ;;  %v439_v33 = vsel %vm420_vm1, %v435_v30, 0.0  ;;  %v445_v37 = vsel %vm420_vm1, %v437_v35, 0.0 }
  0xcf   : > { %v448_v38 = vsel %vm420_vm1, %v438_v36, 0.0 }
  0xd0   : > { %v472_v21 = vmul.f32 %v468_v16, %v337_v18  ;;  %v470_v22 = vmul.f32 %v468_v16, %v335_v19  ;;  %v469_v23 = vmul.f32 %v468_v16, %v334_v20  ;;  %v471_v31 = vmul.f32 %v468_v16, %v336_v28 }
  0xd2   : > { %v482_v24 = vsel %vm420_vm1, %v472_v21, 0.0  ;;  %v476_v25 = vsel %vm420_vm1, %v470_v22, 0.0  ;;  %v473_v26 = vsel %vm420_vm1, %v469_v23, 0.0  ;;  %v479_v34 = vsel %vm420_vm1, %v471_v31, 0.0 }
  0xd3   : > { %483 = vadd.xlane.f32.xlu0 %v482_v24  ;;  %477 = vadd.xlane.f32.xlu2 %v476_v25 }
  0xd4   : > { %474 = vadd.xlane.f32.xlu1 %v473_v26 }
  0xdb   : > { %443 = vadd.xlane.f32.xlu0 %v442_v32  ;;  %440 = vadd.xlane.f32.xlu2 %v439_v33 }
  0xdc   : > { %480 = vadd.xlane.f32.xlu1 %v479_v34  ;;  %v1898_v34 = vmov 32.0  }
  0xe3   : > { %446 = vadd.xlane.f32.xlu0 %v445_v37  ;;  %449 = vadd.xlane.f32.xlu2 %v448_v38 }
 0x146   : > { %v484_v39 = vpop.xlane.xlu0 %483  ;;  %v478_v40 = vpop.xlane.xlu2 %477 }
 0x147   : > { %v475_v41 = vpop.xlane.xlu1 %474 }
 0x14e   : > { %v444_v42 = vpop.xlane.xlu0 %443  ;;  %v441_v43 = vpop.xlane.xlu2 %440 }
 0x14f   : > { %v486_v44 = vadd.f32 %v478_v40, %v444_v42  ;;  %v485_v45 = vadd.f32 %v475_v41, %v441_v43  ;;  %v481_v48 = vpop.xlane.xlu1 %480 }
 0x151   : > { %v1654_v46 = vmul.f32 -1.442695, %v486_v44  ;;  %v1653_v47 = vmul.f32 -1.442695, %v485_v45 }
 0x153   : > { %1748 = vpow2.f32 %v1654_v46 }
 0x154   : > { %1750 = vpow2.f32 %v1653_v47 }
 0x156   : > { %v447_v49 = vpop.xlane.xlu0 %446  ;;  %v450_v50 = vpop.xlane.xlu2 %449 }
 0x157   : > { %v487_v51 = vadd.f32 %v481_v48, %v447_v49  ;;  %v488_v53 = vadd.f32 %v484_v39, %v450_v50 }
 0x159   : > { %v1749_v54 = vpop.eup %1748  ;;  %v1655_v55 = vmul.f32 -1.442695, %v487_v51  ;;  %v1656_v59 = vmul.f32 -1.442695, %v488_v53 }
 0x15a   : > { %v1751_v56 = vpop.eup %1750  ;;  %v502_v57 = vadd.f32 1.0, %v1749_v54 }
 0x15b   : > { %v501_v60 = vadd.f32 1.0, %v1751_v56  ;;  %1752 = vpow2.f32 %v1655_v55 }
 0x15c   : > { %1754 = vrcp.f32 %v502_v57  ;;  %v531_v13 = vand.u32 2147483648, %v502_v57  ;;  %v529_v17 = vand.u32 2147483647, %v502_v57  ;;  %vm525_vm6 = vweird.f32 %v502_v57 }
 0x15d   : > { %1756 = vrcp.f32 %v501_v60  ;;  %v516_v18 = vand.u32 2147483648, %v501_v60  ;;  %v514_v20 = vand.u32 2147483647, %v501_v60  ;;  %vm510_vm8 = vweird.f32 %v501_v60 }
 0x15e   : > { %1758 = vpow2.f32 %v1656_v59  ;;  %v532_v23 = vor.u32 1.1754944e-38, %v531_v13  ;;  %vm530_vm9 = vcmp.eq.f32.partialorder %v529_v17, 8.507059e+37 }
 0x15f   : > { %v517_v26 = vor.u32 1.1754944e-38, %v516_v18  ;;  %vm515_vm11 = vcmp.eq.f32.partialorder %v514_v20, 8.507059e+37 }
 0x161   : > { %v1753_v61 = vpop.eup %1752 }
 0x162   : > { %v1755_v62 = vpop.eup %1754  ;;  %v503_v63 = vadd.f32 1.0, %v1753_v61 }
 0x163   : > { %v1757_v3 = vpop.eup %1756  ;;  %v521_v7 = vmul.f32 %v1755_v62, %v502_v57  ;;  %vm526_vm3 = vweird.f32 %v1755_v62 }
 0x164   : > { %v1759_v8 = vpop.eup %1758  ;;  %v506_v11 = vmul.f32 %v1757_v3, %v501_v60  ;;  %1760 = vrcp.f32 %v503_v63  ;;  %vm511_vm4 = vweird.f32 %v1757_v3  ;;  %vm527_vm7 = vmor %vm525_vm6, %vm526_vm3  ;;  %v546_v32 = vand.u32 2147483648, %v503_v63 }
 0x165   : > { %v522_v12 = vsub.f32 1.0, %v521_v7  ;;  %v2133_v15 = vadd.f32 1.0, %v1759_v8  ;;  %vm512_vm10 = vmor %vm510_vm8, %vm511_vm4  ;;  %v544_v36 = vand.u32 2147483647, %v503_v63  ;;  %vm540_vm13 = vweird.f32 %v503_v63 }
 0x166   : > { %v507_v14 = vsub.f32 1.0, %v506_v11  ;;  %v547_v39 = vor.u32 1.1754944e-38, %v546_v32  ;;  %vm2157_vm6 = vcmp.lt.s32.totalorder %v338_v52, 256  ;;  %vm655_vm8 = vcmask 916480  }
 0x167   : > { %v523_v16 = vmul.f32 %v1755_v62, %v522_v12  ;;  %1762 = vrcp.f32 %v2133_v15  ;;  %vm545_vm15 = vcmp.eq.f32.partialorder %v544_v36, 8.507059e+37  ;;  %v561_v47 = vand.u32 2147483648, %v2133_v15 }
 0x168   : > { %v508_v19 = vmul.f32 %v1757_v3, %v507_v14  ;;  %1764 = vrcp.f32 %v1898_v34  ;;  %v559_v50 = vand.u32 2147483647, %v2133_v15  ;;  %vm555_vm1 = vweird.f32 %v2133_v15 }
 0x169   : > { %v524_v21 = vadd.f32 %v1755_v62, %v523_v16  ;;  %v562_v54 = vor.u32 1.1754944e-38, %v561_v47  ;;  %v674_v47 = vstv %s2152_s29  ;;  %s1899_s29 = smov 80  }
 0x16a   : > { %v1761_v22 = vpop.eup %1760  ;;  %v509_v24 = vadd.f32 %v1757_v3, %v508_v19  ;;  %vm560_vm3 = vcmp.eq.f32.partialorder %v559_v50, 8.507059e+37 }
 0x16b   : > { %v528_v25 = vsel %vm527_vm7, %v1755_v62, %v524_v21  ;;  %v536_v27 = vmul.f32 %v1761_v22, %v503_v63  ;;  %vm541_vm12 = vweird.f32 %v1761_v22  ;;  %vm668_vm7 = vcmask 785408  }
 0x16c   : > { %v533_v28 = vsel %vm530_vm9, %v532_v23, %v528_v25  ;;  %v513_v29 = vsel %vm512_vm10, %v1757_v3, %v509_v24  ;;  %vm542_vm14 = vmor %vm540_vm13, %vm541_vm12  ;;  %vm681_vm9 = vcmask 654336   ;;  %vm696_vm10 = vcmask 523264  }
 0x16d   : > { %567 = vst.msk [vmem:[#allocation4 + $0x8] sm:$0xff] %vm565_vm5, %v533_v28  ;;  %v518_v30 = vsel %vm515_vm11, %v517_v26, %v513_v29  ;;  %v537_v31 = vsub.f32 1.0, %v536_v27  ;;  %v1763_v33 = vpop.eup %1762  ;;  %v572_v41 = vmul.f32 %v533_v28, %v2067_v5  ;;  %v573_v42 = vmul.f32 %v533_v28, %v2070_v6 }
 0x16e   : > { %566 = vst.msk [vmem:[#allocation4] sm:$0xff] %vm565_vm5, %v518_v30  ;;  %v551_v37 = vmul.f32 %v1763_v33, %v2133_v15  ;;  %v570_v43 = vmul.f32 %v518_v30, %v2053_v0  ;;  %v571_v44 = vmul.f32 %v518_v30, %v2056_v1  ;;  %v1765_v48 = vpop.eup %1764  ;;  %vm556_vm0 = vweird.f32 %v1763_v33 }
 0x16f   : > { %v538_v35 = vmul.f32 %v1761_v22, %v537_v31  ;;  %v597_v53 = vmul.f32 32.0, %v1765_v48  ;;  %vm557_vm2 = vmor %vm555_vm1, %vm556_vm0  ;;  %vm601_vm4 = vweird.f32 %v1765_v48  ;;  %vm709_vm11 = vcmask 392192  }
 0x170   : > { %v552_v40 = vsub.f32 1.0, %v551_v37  ;;  %v578_v51 = vadd.f32 %v572_v41, %v570_v43  ;;  %v587_v1 = vadd.f32 %v573_v42, %v571_v44  ;;  %vm722_vm12 = vcmask 261120  }
 0x171   : > { %v539_v38 = vadd.f32 %v1761_v22, %v538_v35  ;;  %v598_v61 = vsub.f32 1.0, %v597_v53  ;;  %vm837_vm13 = vcmask 408576  }
 0x172   : > { %v553_v46 = vmul.f32 %v1763_v33, %v552_v40 }
 0x173   : > { %v543_v45 = vsel %vm542_vm14, %v1761_v22, %v539_v38  ;;  %v599_v14 = vmul.f32 %v1765_v48, %v598_v61  ;;  %v715_v61 = vstv %s2169_s6  ;;  %s2224_s6 = sld [smem:[#allocation5 + $0x5c]]  ;;  %vm738_vm14 = vcmask 416768  }
 0x174   : > { %v548_v49 = vsel %vm545_vm15, %v547_v39, %v543_v45  ;;  %v554_v0 = vadd.f32 %v1763_v33, %v553_v46  ;;  %v659_v45 = vstv %s1569_s23  ;;  %v646_v46 = vstv %s1562_s30  ;;  %s1901_s23 = smov 112   ;;  %s2211_s30 = sld [smem:[#allocation5 + $0x39]] }
 0x175   : > { %568 = vst.msk [vmem:[#allocation4 + $0x10] sm:$0xff] %vm565_vm5, %v548_v49  ;;  %v574_v5 = vmul.f32 %v548_v49, %v2059_v2  ;;  %v575_v6 = vmul.f32 %v548_v49, %v2064_v4  ;;  %v600_v22 = vadd.f32 %v1765_v48, %v599_v14  ;;  %v648_v49 = vstv %s1611_s25  ;;  %s2216_s25 = sld [smem:[#allocation5 + $0x40]] }
 0x176   : > { %v558_v57 = vsel %vm557_vm2, %v1763_v33, %v554_v0  ;;  %vm936_vm15 = vcmask 400384  }
 0x177   : > { %v579_v55 = vadd.f32 %v578_v51, %v574_v5  ;;  %v588_v56 = vadd.f32 %v587_v1, %v575_v6  ;;  %v563_v58 = vsel %vm560_vm3, %v562_v54, %v558_v57  ;;  %v614_v59 = vmax.f32 %v570_v43, %v574_v5 }
 0x178   : > { %v623_v60 = vmax.f32 %v571_v44, %v575_v6  ;;  %569 = vst.msk [vmem:[#allocation4 + $0x18] sm:$0xff] %vm565_vm5, %v563_v58  ;;  %v576_v2 = vmul.f32 %v563_v58, %v2077_v9  ;;  %v577_v4 = vmul.f32 %v563_v58, %v2080_v10  ;;  %v602_v30 = vsel %vm601_vm4, %v1765_v48, %v600_v22 }
 0x179   : > { %vm608_vm5 = vcmask 1040384   ;;  %v672_v44 = vstv %s1576_s22  ;;  %v661_v48 = vstv %s2154_s13  ;;  %s2676_s13 = smov 96   ;;  %s2204_s22 = sld [smem:[#allocation5 + $0xf]] }
 0x17a   : > { %v580_v62 = vadd.f32 %v579_v55, %v576_v2  ;;  %v589_v63 = vadd.f32 %v588_v56, %v577_v4  ;;  %v615_v3 = vmax.f32 %v572_v41, %v576_v2  ;;  %v624_v7 = vmax.f32 %v573_v42, %v577_v4 }
 0x17b   : > { %v700_v2 = vstv %s2173_s9  ;;  %s2678_s9 = smov 32  }
 0x17c   : > { %v581_v8 = vrot.slane %v580_v62, 4  ;;  %v590_v11 = vrot.slane %v589_v63, 4  ;;  %v616_v12 = vmax.f32 %v614_v59, %v615_v3  ;;  %v625_v13 = vmax.f32 %v623_v60, %v624_v7 }
 0x17d   : > { %v713_v59 = vstv %s2167_s5  ;;  %v687_v60 = vstv %s2171_s10  ;;  %v702_v7 = vstv %s2181_s7  ;;  %s2222_s5 = sld [smem:[#allocation5 + $0x2b]] }
 0x17e   : > { %v582_v15 = vadd.f32 %v581_v8, %v580_v62  ;;  %v591_v16 = vadd.f32 %v590_v11, %v589_v63  ;;  %v617_v17 = vrot.slane %v616_v12, 4  ;;  %v626_v18 = vrot.slane %v625_v13, 4  ;;  %s2228_s10 = sld [smem:[#allocation5 + $0x1d]] }
 0x17f   : > { %v689_v62 = vstv %s2177_s12  ;;  %s1903_s12 = smov 64   ;;  %s2233_s7 = sld [smem:[#allocation5 + $0x24]] }
 0x180   : > { %v583_v19 = vrot.slane %v582_v15, 2  ;;  %v592_v20 = vrot.slane %v591_v16, 2  ;;  %v618_v21 = vmax.f32 %v616_v12, %v617_v17  ;;  %v627_v9 = vmax.f32 %v625_v13, %v626_v18 }
 0x181   : > { %v777_v17 = vstv %s2191_s11  ;;  %v753_v18 = vstv %s2199_s26  ;;  %s2238_s11 = sld [smem:[#allocation5 + $0x4e]] }
 0x182   : > { %v584_v10 = vadd.f32 %v583_v19, %v582_v15  ;;  %v593_v23 = vadd.f32 %v592_v20, %v591_v16  ;;  %v619_v24 = vrot.slane %v618_v21, 2  ;;  %v628_v25 = vrot.slane %v627_v9, 2  ;;  %s1640_s26 = sld [smem:[#allocation5 + $0x55]] }
 0x183   : > { %v765_v19 = vstv %s2204_s22  ;;  %v779_v20 = vstv %s2193_s20  ;;  %s2247_s20 = sld [smem:[#allocation5 + $0x17]] }
 0x184   : > { %v585_v26 = vrot.slane %v584_v10, 1  ;;  %v594_v27 = vrot.slane %v593_v23, 1  ;;  %v620_v28 = vmax.f32 %v618_v21, %v619_v24  ;;  %v629_v29 = vmax.f32 %v627_v9, %v628_v25  ;;  %s2249_s22 = sld [smem:[#allocation5 + $0x48]] }
 0x185   : > { %v755_v21 = vstv %s2211_s30  ;;  %s2253_s30 = sld [smem:[#allocation5 + $0x9]] }
 0x186   : > { %v586_v31 = vadd.f32 %v585_v26, %v584_v10  ;;  %v595_v32 = vadd.f32 %v594_v27, %v593_v23  ;;  %v621_v33 = vrot.slane %v620_v28, 1  ;;  %v630_v34 = vrot.slane %v629_v29, 1 }
 0x187   : > { %v767_v10 = vstv %s2216_s25  ;;  %s2258_s25 = sld [smem:[#allocation5 + $0x10]] }
 0x188   : > { %v604_v35 = vmul.f32 %v602_v30, %v595_v32  ;;  %v631_v36 = vmax.f32 %v629_v29, %v630_v34  ;;  %v603_v37 = vmul.f32 %v602_v30, %v586_v31  ;;  %v622_v39 = vmax.f32 %v620_v28, %v621_v33 }
 0x189   : > { %v813_v30 = vstv %s2222_s5  ;;  %v789_v31 = vstv %s2228_s10  ;;  %v801_v32 = vstv %s2233_s7  ;;  %v815_v33 = vstv %s2224_s6  ;;  %s1620_s5 = sld [smem:[#allocation5 + $0x41]] }
 0x18a   : > { %v607_v38 = vrot.slane %v604_v35, 7  ;;  %v634_v40 = vrot.slane %v631_v36, 7  ;;  %v791_v34 = vstv %s2238_s11  ;;  %s2271_s6 = sld [smem:[#allocation5 + $0xb]] }
 0x18b   : > { %s2273_s10 = sld [smem:[#allocation5 + $0x3c]] }
 0x18c   : > { %v609_v42 = vsel %vm608_vm5, %v603_v37, %v607_v38  ;;  %v635_v43 = vsel %vm608_vm5, %v622_v39, %v634_v40  ;;  %v803_v37 = vstv %s1640_s26  ;;  %s2277_s7 = sld [smem:[#allocation5 + $0x1e]]  ;;  %s2690_s26 = smov 48  }
 0x18d   : > { %613 = vst.msk [vmem:[#allocation2 + $0x1] sm:$0x3] %vm2157_vm6, %v609_v42  ;;  %s2282_s11 = sld [smem:[#allocation5 + $0xa]] }
 0x18e   : > { %637 = vst.msk [vmem:[#allocation3 + $0x1] sm:$0x3] %vm2157_vm6, %v635_v43 }
 0x194   : > { %v2179_v50 = vld [vmem:[#allocation2] sm:$0x7] }
 0x195   : > { %v2183_v5 = vld [vmem:[#allocation3] sm:$0x7]  ;;  %v673_v6 = vmul.f32 %v672_v44, %v2179_v50  ;;  %v660_v0 = vmul.f32 %v659_v45, %v2179_v50  ;;  %v647_v51 = vmul.f32 %v646_v46, %v2179_v50  ;;  %v2195_v58 = vld [vmem:[#allocation2 + $0x1] sm:$0x7]  ;;  %v778_v9 = vmul.f32 %v777_v17, %v2179_v50 }
 0x196   : > { %v675_v1 = vmul.f32 %v674_v47, %v2183_v5  ;;  %v662_v53 = vmul.f32 %v661_v48, %v2183_v5  ;;  %v649_v54 = vmul.f32 %v648_v49, %v2183_v5  ;;  %v2206_v4 = vld [vmem:[#allocation3 + $0x1] sm:$0x7]  ;;  %v714_v63 = vmul.f32 %v713_v59, %v2195_v58 }
 0x197   : > { %v688_v3 = vmul.f32 %v687_v60, %v2195_v58  ;;  %v701_v8 = vmul.f32 %v700_v2, %v2195_v58  ;;  %v716_v11 = vmul.f32 %v715_v61, %v2206_v4  ;;  %v690_v12 = vmul.f32 %v689_v62, %v2206_v4 }
 0x198   : > { %v676_v55 = vadd.f32 %v675_v1, %v673_v6  ;;  %v663_v56 = vadd.f32 %v662_v53, %v660_v0  ;;  %v650_v57 = vadd.f32 %v649_v54, %v647_v51  ;;  %v703_v13 = vmul.f32 %v702_v7, %v2206_v4 }
 0x199   : > { %v717_v14 = vadd.f32 %v716_v11, %v714_v63  ;;  %v691_v15 = vadd.f32 %v690_v12, %v688_v3  ;;  %v754_v22 = vmul.f32 %v753_v18, %v2179_v50  ;;  %v766_v23 = vmul.f32 %v765_v19, %v2179_v50 }
 0x19a   : > { %678 = vrot.lane.b32.xlu0 %v676_v55, %s1899_s29  ;;  %665 = vrot.lane.b32.xlu2 %v663_v56, %s2676_s13  ;;  %v704_v16 = vadd.f32 %v703_v13, %v701_v8  ;;  %v780_v24 = vmul.f32 %v779_v20, %v2183_v5  ;;  %v756_v25 = vmul.f32 %v755_v21, %v2183_v5  ;;  %v876_v46 = vstv %s2247_s20  ;;  %s1614_s20 = sld [smem:[#allocation5 + $0x3b]] }
 0x19b   : > { %652 = vrot.lane.b32.xlu1 %v650_v57, %s1901_s23  ;;  %v768_v26 = vmul.f32 %v767_v10, %v2183_v5  ;;  %v814_v35 = vmul.f32 %v813_v30, %v2195_v58  ;;  %v790_v36 = vmul.f32 %v789_v31, %v2195_v58  ;;  %v802_v38 = vmul.f32 %v801_v32, %v2195_v58 }
 0x19c   : > { %v781_v27 = vadd.f32 %v780_v24, %v778_v9  ;;  %v757_v28 = vadd.f32 %v756_v25, %v754_v22  ;;  %v816_v39 = vmul.f32 %v815_v33, %v2206_v4  ;;  %v792_v40 = vmul.f32 %v791_v34, %v2206_v4  ;;  %v975_v33 = vld [vmem:[#allocation2 + $0x1] sm:$0x3] }
 0x19d   : > { %v769_v29 = vadd.f32 %v768_v26, %v766_v23  ;;  %v804_v42 = vmul.f32 %v803_v37, %v2206_v4  ;;  %v852_v47 = vstv %s2253_s30  ;;  %v864_v48 = vstv %s2258_s25  ;;  %s2301_s30 = sld [smem:[#allocation5 + $0x11]]  ;;  %v976_v37 = vld [vmem:[#allocation3 + $0x1] sm:$0x3] }
 0x19e   : > { %v817_v43 = vadd.f32 %v816_v39, %v814_v35  ;;  %v793_v44 = vadd.f32 %v792_v40, %v790_v36  ;;  %v878_v49 = vstv %s2249_s22  ;;  %v877_v0 = vmul.f32 %v876_v46, %v2179_v50  ;;  %s2297_s22 = sld [smem:[#allocation5 + $0x3d]] }
 0x19f   : > { %v805_v45 = vadd.f32 %v804_v42, %v802_v38  ;;  %v853_v51 = vmul.f32 %v852_v47, %v2179_v50  ;;  %v866_v1 = vstv %s1620_s5  ;;  %v865_v53 = vmul.f32 %v864_v48, %v2179_v50  ;;  %s2306_s25 = sld [smem:[#allocation5 + $0x12]]  ;;  %s2691_s5 = smov 96  }
 0x1a0   : > { %v879_v54 = vmul.f32 %v878_v49, %v2183_v5  ;;  %v867_v56 = vmul.f32 %v866_v1, %v2183_v5  ;;  %v1047_v2 = vstv %s2271_s6  ;;  %v888_v61 = vstv %s2277_s7  ;;  %s1622_s6 = sld [smem:[#allocation5 + $0x43]] }
 0x1a1   : > { %v951_v62 = vstv %s2282_s11  ;;  %v1049_v63 = vstv %s2273_s10  ;;  %v1048_v7 = vmul.f32 %v1047_v2, %v2179_v50  ;;  %v889_v8 = vmul.f32 %v888_v61, %v2195_v58  ;;  %s2321_s10 = sld [smem:[#allocation5 + $0x4a]] }
 0x1a2   : > { %719 = vrot.lane.b32.xlu0 %v717_v14, %s2678_s9  ;;  %693 = vrot.lane.b32.xlu2 %v691_v15, %s1903_s12  ;;  %v880_v57 = vadd.f32 %v879_v54, %v877_v0  ;;  %v868_v60 = vadd.f32 %v867_v56, %v865_v53  ;;  %v953_v11 = vstv %s1614_s20  ;;  %v952_v12 = vmul.f32 %v951_v62, %v2179_v50  ;;  %s2325_s7 = sld [smem:[#allocation5 + $0x18]] }
 0x1a3   : > { %706 = vrot.lane.b32.xlu1 %v704_v16, %s2674_s14  ;;  %s2263_s14 = sld [smem:[#allocation5 + $0x3a]]  ;;  %v1050_v13 = vmul.f32 %v1049_v63, %v2183_v5  ;;  %v954_v15 = vmul.f32 %v953_v11, %v2183_v5  ;;  %v963_v20 = vstv %s2301_s30 }
 0x1a4   : > { %s2330_s11 = sld [smem:[#allocation5 + $0x25]]  ;;  %v1148_v9 = vstv %s2297_s22  ;;  %v964_v23 = vmul.f32 %v963_v20, %v2179_v50 }
 0x1a5   : > { %v1051_v16 = vadd.f32 %v1050_v13, %v1048_v7  ;;  %v955_v18 = vadd.f32 %v954_v15, %v952_v12  ;;  %v1059_v21 = vstv %s2306_s25  ;;  %s2335_s20 = sld [smem:[#allocation5 + $0x49]]  ;;  %v1149_v26 = vmul.f32 %v1148_v9, %v2183_v5 }
 0x1a6   : > { %v1061_v24 = vstv %s1622_s6  ;;  %v1060_v25 = vmul.f32 %v1059_v21, %v2179_v50  ;;  %s2345_s22 = sld [smem:[#allocation5 + $0x50]] }
 0x1a7   : > { %s2349_s30 = sld [smem:[#allocation5 + $0x13]]  ;;  %v1073_v36 = vstv %s2321_s10 }
 0x1a8   : > { %v977_v34 = vstv %s2325_s7  ;;  %s2354_s25 = sld [smem:[#allocation5 + $0xd]] }
 0x1a9   : > { %v854_v6 = vstv %s2263_s14  ;;  %s2295_s14 = sld [smem:[#allocation5 + $0xc]]  ;;  %v978_v40 = vmul.f32 %v977_v34, %v975_v33 }
 0x1aa   : > { %783 = vrot.lane.b32.xlu0 %v781_v27, %s1899_s29  ;;  %759 = vrot.lane.b32.xlu2 %v757_v28, %s1901_s23  ;;  %v855_v55 = vmul.f32 %v854_v6, %v2183_v5  ;;  %v1062_v28 = vmul.f32 %v1061_v24, %v2183_v5  ;;  %v900_v35 = vstv %s2330_s11  ;;  %s2359_s6 = sld [smem:[#allocation5 + $0x44]] }
 0x1ab   : > { %771 = vrot.lane.b32.xlu1 %v769_v29, %s2676_s13  ;;  %s2287_s13 = sld [smem:[#allocation5 + $0x4f]]  ;;  %v979_v38 = vstv %s2335_s20 }
 0x1ac   : > { %v856_v59 = vadd.f32 %v855_v55, %v853_v51  ;;  %v1063_v31 = vadd.f32 %v1062_v28, %v1060_v25  ;;  %s2365_s10 = sld [smem:[#allocation5 + $0x1a]]  ;;  %v991_v1 = vstv %s2345_s22 }
 0x1ad   : > { %s2367_s7 = sld [smem:[#allocation5 + $0x4b]]  ;;  %v1158_v0 = vstv %s2349_s30 }
 0x1ae   : > { %s2371_s11 = sld [smem:[#allocation5 + $0x2c]]  ;;  %v1245_v51 = vstv %s2354_s25  ;;  %v1159_v55 = vmul.f32 %v1158_v0, %v2179_v50 }
 0x1af   : > { %v1146_v19 = vstv %s2295_s14  ;;  %s1641_s14 = sld [smem:[#allocation5 + $0x56]] }
 0x1b0   : > { %v1147_v10 = vmul.f32 %v1146_v19, %v2179_v50  ;;  %s2376_s20 = sld [smem:[#allocation5 + $0x20]]  ;;  %v1160_v53 = vstv %s2359_s6 }
 0x1b1   : > { %v890_v3 = vstv %s2287_s13  ;;  %s2319_s13 = sld [smem:[#allocation5 + $0x19]] }
 0x1b2   : > { %819 = vrot.lane.b32.xlu0 %v817_v43, %s2678_s9  ;;  %795 = vrot.lane.b32.xlu2 %v793_v44, %s1903_s12  ;;  %s2311_s9 = sld [smem:[#allocation5 + $0x42]]  ;;  %v891_v14 = vmul.f32 %v890_v3, %v2206_v4  ;;  %v1150_v29 = vadd.f32 %v1149_v26, %v1147_v10  ;;  %v901_v43 = vmul.f32 %v900_v35, %v2195_v58  ;;  %v1170_v3 = vstv %s2365_s10 }
 0x1b3   : > { %807 = vrot.lane.b32.xlu1 %v805_v45, %s2690_s26  ;;  %v1074_v44 = vmul.f32 %v1073_v36, %v2206_v4  ;;  %v980_v45 = vmul.f32 %v979_v38, %v976_v37  ;;  %s2389_s22 = sld [smem:[#allocation5 + $0x27]]  ;;  %v1172_v11 = vstv %s2367_s7  ;;  %v1171_v13 = vmul.f32 %v1170_v3, %v2195_v58 }
 0x1b4   : > { %v892_v17 = vadd.f32 %v891_v14, %v889_v8  ;;  %s2391_s30 = sld [smem:[#allocation5 + $0x58]]  ;;  %v912_v7 = vstv %s2371_s11 }
 0x1b5   : > { %v902_v42 = vstv %s1641_s14  ;;  %v981_v48 = vadd.f32 %v980_v45, %v978_v40  ;;  %s2381_s14 = sld [smem:[#allocation5 + $0x5d]]  ;;  %v913_v14 = vmul.f32 %v912_v7, %v2195_v58 }
 0x1b6   : > { %v903_v46 = vmul.f32 %v902_v42, %v2206_v4  ;;  %s2395_s25 = sld [smem:[#allocation5 + $0x14]]  ;;  %v1083_v8 = vstv %s2376_s20  ;;  %s2692_s20 = smov 32  }
 0x1b7   : > { %v1071_v32 = vstv %s2319_s13  ;;  %s1617_s13 = sld [smem:[#allocation5 + $0x3e]] }
 0x1b8   : > { %v965_v22 = vstv %s2311_s9  ;;  %s2343_s9 = sld [smem:[#allocation5 + $0x1f]]  ;;  %v1072_v39 = vmul.f32 %v1071_v32, %v2195_v58  ;;  %v904_v49 = vadd.f32 %v903_v46, %v901_v43 }
 0x1b9   : > { %v966_v27 = vmul.f32 %v965_v22, %v2183_v5  ;;  %s2400_s6 = sld [smem:[#allocation5 + $0x26]]  ;;  %v1095_v22 = vstv %s2389_s22 }
 0x1ba   : > { %882 = vrot.lane.b32.xlu0 %v880_v57, %s1899_s29  ;;  %858 = vrot.lane.b32.xlu2 %v856_v59, %s1901_s23  ;;  %v1075_v47 = vadd.f32 %v1074_v44, %v1072_v39  ;;  %v1246_v57 = vmul.f32 %v1245_v51, %v2179_v50  ;;  %v992_v59 = vmul.f32 %v991_v1, %v2206_v4  ;;  %s1642_s10 = sld [smem:[#allocation5 + $0x57]]  ;;  %v1097_v24 = vstv %s2391_s30 }
 0x1bb   : > { %870 = vrot.lane.b32.xlu1 %v868_v60, %s2691_s5  ;;  %v967_v30 = vadd.f32 %v966_v27, %v964_v23  ;;  %v1161_v60 = vmul.f32 %v1160_v53, %v2183_v5  ;;  %v914_v12 = vstv %s2381_s14  ;;  %s2415_s7 = sld [smem:[#allocation5 + $0x5e]]  ;;  %v1096_v26 = vmul.f32 %v1095_v22, %v2195_v58 }
 0x1bc   : > { %v1257_v10 = vstv %s2395_s25  ;;  %s2419_s11 = sld [smem:[#allocation5 + $0x21]] }
 0x1bd   : > { %v1247_v56 = vstv %s1617_s13  ;;  %v1162_v62 = vadd.f32 %v1161_v60, %v1159_v55  ;;  %s2405_s13 = sld [smem:[#allocation5 + $0x45]]  ;;  %v1258_v27 = vmul.f32 %v1257_v10, %v2179_v50 }
 0x1be   : > { %v989_v6 = vstv %s2343_s9  ;;  %s1636_s9 = sld [smem:[#allocation5 + $0x51]]  ;;  %v1248_v2 = vmul.f32 %v1247_v56, %v2183_v5 }
 0x1bf   : > { %v990_v54 = vmul.f32 %v989_v6, %v2195_v58  ;;  %v1001_v23 = vstv %s2400_s6  ;;  %s2424_s14 = sld [smem:[#allocation5 + $0x1b]] }
 0x1c0   : > { %v1249_v63 = vadd.f32 %v1248_v2, %v1246_v57  ;;  %v1003_v28 = vstv %s1642_s10  ;;  %s1631_s22 = sld [smem:[#allocation5 + $0x4c]] }
 0x1c1   : > { %v993_v61 = vadd.f32 %v992_v59, %v990_v54  ;;  %v1004_v32 = vmul.f32 %v1003_v28, %v2206_v4  ;;  %s2437_s30 = sld [smem:[#allocation5 + $0x22]]  ;;  %v1015_v39 = vstv %s2415_s7 }
 0x1c2   : > { %1053 = vrot.lane.b32.xlu0 %v1051_v16, %s1901_s23  ;;  %894 = vrot.lane.b32.xlu2 %v892_v17, %s1903_s12  ;;  %v1084_v16 = vmul.f32 %v1083_v8, %v2195_v58  ;;  %v1173_v17 = vmul.f32 %v1172_v11, %v2206_v4  ;;  %s2439_s25 = sld [smem:[#allocation5 + $0x53]]  ;;  %v1182_v37 = vstv %s2419_s11  ;;  %v1016_v46 = vmul.f32 %v1015_v39, %v2206_v4 }
 0x1c3   : > { %957 = vrot.lane.b32.xlu1 %v955_v18, %s1901_s23  ;;  %v915_v18 = vmul.f32 %v914_v12, %v2206_v4  ;;  %v1259_v25 = vstv %s2405_s13  ;;  %s2443_s6 = sld [smem:[#allocation5 + $0x2e]]  ;;  %v1183_v43 = vmul.f32 %v1182_v37, %v2195_v58 }
 0x1c4   : > { %v1085_v15 = vstv %s1636_s9  ;;  %v1174_v20 = vadd.f32 %v1173_v17, %v1171_v13  ;;  %s2429_s9 = sld [smem:[#allocation5 + $0x52]] }
 0x1c5   : > { %v1086_v19 = vmul.f32 %v1085_v15, %v2206_v4  ;;  %v916_v21 = vadd.f32 %v915_v18, %v913_v14  ;;  %v1269_v38 = vstv %s2424_s14  ;;  %s2448_s13 = sld [smem:[#allocation5 + $0x28]] }
 0x1c6   : > { %s2453_s10 = sld [smem:[#allocation5 + $0x5f]]  ;;  %v1271_v44 = vstv %s1631_s22  ;;  %v1270_v45 = vmul.f32 %v1269_v38, %v2195_v58 }
 0x1c7   : > { %v1087_v9 = vadd.f32 %v1086_v19, %v1084_v16  ;;  %s2463_s7 = sld [smem:[#allocation5 + $0x61]]  ;;  %v1281_v51 = vstv %s2437_s30 }
 0x1c8   : > { %s2467_s11 = sld [smem:[#allocation5 + $0x2f]]  ;;  %v1283_v54 = vstv %s2439_s25  ;;  %v1282_v57 = vmul.f32 %v1281_v51, %v2195_v58  ;;  %s1905_s25 = smov 51  }
 0x1c9   : > { %v1107_v1 = vstv %s2443_s6  ;;  %s1596_s14 = sld [smem:[#allocation5 + $0x29]] }
 0x1ca   : > { %1152 = vrot.lane.b32.xlu0 %v1150_v29, %s1901_s23  ;;  %969 = vrot.lane.b32.xlu2 %v967_v30, %s2691_s5  ;;  %v1002_v29 = vmul.f32 %v1001_v23, %v2195_v58  ;;  %v1098_v30 = vmul.f32 %v1097_v24, %v2206_v4  ;;  %v1184_v40 = vstv %s2429_s9  ;;  %s1651_s9 = sld [smem:[#allocation5 + $0x60]]  ;;  %v1108_v59 = vmul.f32 %v1107_v1, %v2195_v58 }
 0x1cb   : > { %1065 = vrot.lane.b32.xlu1 %v1063_v31, %s2691_s5  ;;  %v1260_v31 = vmul.f32 %v1259_v25, %v2183_v5  ;;  %v1194_v53 = vstv %s2448_s13  ;;  %s1645_s22 = sld [smem:[#allocation5 + $0x5a]] }
 0x1cc   : > { %v1099_v33 = vadd.f32 %v1098_v30, %v1096_v26  ;;  %v1005_v35 = vadd.f32 %v1004_v32, %v1002_v29  ;;  %v1109_v55 = vstv %s2453_s10  ;;  %v1195_v2 = vmul.f32 %v1194_v53, %v2195_v58  ;;  %s1556_s30 = sld [smem:[#allocation5 + $0x1]]  ;;  %s1906_s10 = smov 50  }
 0x1cd   : > { %v1261_v34 = vadd.f32 %v1260_v31, %v1258_v27  ;;  %v1307_v14 = vstv %s2463_s7  ;;  %s1557_s6 = sld [smem:[#allocation5 + $0x2]] }
 0x1ce   : > { %v1206_v12 = vstv %s2467_s11  ;;  %s1606_s13 = sld [smem:[#allocation5 + $0x33]] }
 0x1cf   : > { %v1293_v13 = vstv %s1596_s14  ;;  %v1207_v18 = vmul.f32 %v1206_v12, %v2195_v58  ;;  %s1558_s7 = sld [smem:[#allocation5 + $0x3]]  ;;  %s1907_s14 = smov 49  }
 0x1d0   : > { %v1208_v15 = vstv %s1651_s9  ;;  %s1607_s11 = sld [smem:[#allocation5 + $0x34]] }
 0x1d1   : > { %v1295_v19 = vstv %s1645_s22  ;;  %s2545_s9 = sld [smem:[#allocation5 + $0x5]] }
 0x1d2   : > { %1077 = vrot.lane.b32.xlu0 %v1075_v47, %s1899_s29  ;;  %983 = vrot.lane.b32.xlu2 %v981_v48, %s1899_s29  ;;  %v1185_v47 = vmul.f32 %v1184_v40, %v2206_v4  ;;  %v1272_v48 = vmul.f32 %v1271_v44, %v2206_v4  ;;  %v1296_v22 = vmul.f32 %v1295_v19, %v2206_v4  ;;  %s2551_s22 = sld [smem:[#allocation5 + $0x36]] }
 0x1d3   : > { %906 = vrot.lane.b32.xlu1 %v904_v49, %s2690_s26 }
 0x1d4   : > { %v1186_v6 = vadd.f32 %v1185_v47, %v1183_v43  ;;  %v1273_v0 = vadd.f32 %v1272_v48, %v1270_v45  ;;  %v747_v47 = vstv %s1556_s30  ;;  %s1909_s30 = smov 47  }
 0x1d5   : > { %v748_v53 = vmul.f32 %v747_v47, %v2179_v50 }
 0x1da   : > { %995 = vrot.lane.b32.xlu0 %v993_v61, %s1903_s12  ;;  %1164 = vrot.lane.b32.xlu2 %v1162_v62, %s2691_s5  ;;  %v1284_v61 = vmul.f32 %v1283_v54, %v2206_v4  ;;  %v1110_v62 = vmul.f32 %v1109_v55, %v2206_v4 }
 0x1db   : > { %1251 = vrot.lane.b32.xlu1 %v1249_v63, %s1901_s23  ;;  %s2413_s23 = sld [smem:[#allocation5 + $0x2d]] }
 0x1dc   : > { %v1285_v3 = vadd.f32 %v1284_v61, %v1282_v57  ;;  %v1111_v7 = vadd.f32 %v1110_v62, %v1108_v59 }
 0x1e1   : > { %v1013_v36 = vstv %s2413_s23  ;;  %s1644_s23 = sld [smem:[#allocation5 + $0x59]] }
 0x1e2   : > { %1176 = vrot.lane.b32.xlu0 %v1174_v20, %s1899_s29  ;;  %918 = vrot.lane.b32.xlu2 %v916_v21, %s2692_s20  ;;  %v1014_v42 = vmul.f32 %v1013_v36, %v2195_v58  ;;  %v1294_v20 = vmul.f32 %v1293_v13, %v2195_v58  ;;  %v1308_v21 = vmul.f32 %v1307_v14, %v2206_v4 }
 0x1e3   : > { %1089 = vrot.lane.b32.xlu1 %v1087_v9, %s1903_s12  ;;  %v1209_v9 = vmul.f32 %v1208_v15, %v2206_v4 }
 0x1e4   : > { %v1017_v49 = vadd.f32 %v1016_v46, %v1014_v42  ;;  %v1297_v24 = vadd.f32 %v1296_v22, %v1294_v20 }
 0x1e5   : > { %v1210_v23 = vadd.f32 %v1209_v9, %v1207_v18 }
 0x1e7   : > { %v1196_v60 = vstv %s1644_s23  ;;  %s1559_s23 = sld [smem:[#allocation5 + $0x4]] }
 0x1e8   : > { %v1197_v63 = vmul.f32 %v1196_v60, %v2206_v4 }
 0x1ea   : > { %1101 = vrot.lane.b32.xlu0 %v1099_v33, %s2690_s26  ;;  %1263 = vrot.lane.b32.xlu2 %v1261_v34, %s2691_s5  ;;  %s2461_s5 = sld [smem:[#allocation5 + $0x30]]  ;;  %v1198_v8 = vadd.f32 %v1197_v63, %v1195_v2 }
 0x1eb   : > { %1007 = vrot.lane.b32.xlu1 %v1005_v35, %s2690_s26 }
 0x1f0   : > { %v1305_v11 = vstv %s2461_s5  ;;  %s1608_s5 = sld [smem:[#allocation5 + $0x35]] }
 0x1f1   : > { %v1306_v17 = vmul.f32 %v1305_v11, %v2195_v58 }
 0x1f2   : > { %1019 = vrot.lane.b32.xlu0 %v1017_v49, %s2692_s20  ;;  %1188 = vrot.lane.b32.xlu2 %v1186_v6, %s1903_s12 }
 0x1f3   : > { %1275 = vrot.lane.b32.xlu1 %v1273_v0, %s1899_s29  ;;  %v1309_v10 = vadd.f32 %v1308_v21, %v1306_v17  ;;  %s232_s29 = sld [smem:[#allocation5]] }
 0x1f4   : > { %v666_v56 = vpop.permute.xlu2 %665 }
 0x1f5   : > { %v667_v31 = vrot.slane %v666_v56, 1 }
 0x1f7   : > { %v669_v37 = vsel %vm668_vm7, %v666_v56, %v667_v31 }
 0x1f9   : > { %v640_v26 = vstv %s232_s29  ;;  %s2564_s29 = sld [smem:[#allocation5 + $0x6]] }
 0x1fa   : > { %1287 = vrot.lane.b32.xlu0 %v1285_v3, %s1903_s12  ;;  %1113 = vrot.lane.b32.xlu2 %v1111_v7, %s2692_s20  ;;  %s1604_s12 = sld [smem:[#allocation5 + $0x31]]  ;;  %v641_v27 = vmul.f32 %v640_v26, %v2179_v50 }
 0x1fb   : > { %1200 = vrot.lane.b32.xlu1 %v1198_v8, %s2690_s26 }
 0x1fc   : > { %v694_v16 = vpop.permute.xlu2 %693 }
 0x1fd   : > { %v695_v38 = vrot.slane %v694_v16, 7 }
 0x1ff   : > { %v697_v46 = vsel %vm696_vm10, %v695_v38, %v694_v16 }
 0x200   : > { %v642_v58 = vstv %s1604_s12  ;;  %s2567_s12 = sld [smem:[#allocation5 + $0x37]] }
 0x201   : > { %v643_v4 = vmul.f32 %v642_v58, %v2183_v5 }
 0x202   : > { %1311 = vrot.lane.b32.xlu0 %v1309_v10, %s2692_s20  ;;  %1212 = vrot.lane.b32.xlu2 %v1210_v23, %s2692_s20  ;;  %s1605_s20 = sld [smem:[#allocation5 + $0x32]] }
 0x203   : > { %1299 = vrot.lane.b32.xlu1 %v1297_v24, %s2690_s26  ;;  %v644_v33 = vadd.f32 %v643_v4, %v641_v27 }
 0x204   : > { %v760_v25 = vpop.permute.xlu2 %759 }
 0x205   : > { %v761_v51 = vrot.slane %v760_v25, 1 }
 0x207   : > { %v762_v59 = vsel %vm655_vm8, %v760_v25, %v761_v51 }
 0x208   : > { %v749_v0 = vstv %s1605_s20  ;;  %s1910_s20 = smov 46  }
 0x209   : > { %v750_v56 = vmul.f32 %v749_v0, %v2183_v5 }
 0x20b   : > { %v751_v61 = vadd.f32 %v750_v56, %v748_v53 }
 0x20c   : > { %v679_v28 = vpop.permute.xlu0 %678  ;;  %v796_v29 = vpop.permute.xlu2 %795 }
 0x20d   : > { %v653_v30 = vpop.permute.xlu1 %652  ;;  %v680_v34 = vrot.slane %v679_v28, 1  ;;  %v764_v12 = vadd.f32 %v762_v59, %v751_v61  ;;  %v797_v15 = vrot.slane %v796_v29, 7 }
 0x20e   : > { %v654_v32 = vrot.slane %v653_v30, 1 }
 0x20f   : > { %v682_v40 = vsel %vm681_vm9, %v679_v28, %v680_v34  ;;  %v798_v21 = vsel %vm696_vm10, %v797_v15, %v796_v29  ;;  %v846_v29 = vstv %s1557_s6 }
 0x210   : > { %v656_v35 = vsel %vm655_vm8, %v653_v30, %v654_v32 }
 0x211   : > { %v658_v36 = vadd.f32 %v656_v35, %v644_v33  ;;  %v848_v35 = vstv %s1606_s13 }
 0x213   : > { %v671_v39 = vadd.f32 %v669_v37, %v658_v36  ;;  %v847_v37 = vmul.f32 %v846_v29, %v2179_v50 }
 0x214   : > { %v720_v42 = vpop.permute.xlu0 %719  ;;  %v2501_v43 = vpop.permute.xlu2 %858 }
 0x215   : > { %v707_v44 = vpop.permute.xlu1 %706  ;;  %v684_v45 = vadd.f32 %v682_v40, %v671_v39  ;;  %v721_v48 = vrot.slane %v720_v42, 7  ;;  %v860_v36 = vrot.slane %v2501_v43, 1  ;;  %v849_v39 = vmul.f32 %v848_v35, %v2183_v5 }
 0x216   : > { %v708_v49 = vrot.slane %v707_v44, 7 }
 0x217   : > { %v699_v6 = vadd.f32 %v697_v46, %v684_v45  ;;  %v723_v55 = vsel %vm722_vm12, %v721_v48, %v720_v42  ;;  %v861_v40 = vsel %vm655_vm8, %v2501_v43, %v860_v36  ;;  %v850_v42 = vadd.f32 %v849_v39, %v847_v37 }
 0x218   : > { %v710_v1 = vsel %vm709_vm11, %v708_v49, %v707_v44 }
 0x219   : > { %v712_v54 = vadd.f32 %v710_v1, %v699_v6  ;;  %v863_v47 = vadd.f32 %v861_v40, %v850_v42  ;;  %v1140_v40 = vstv %s2545_s9 }
 0x21b   : > { %v725_v57 = vadd.f32 %v723_v55, %v712_v54 }
 0x21c   : > { %v784_v60 = vpop.permute.xlu0 %783  ;;  %v2509_v2 = vpop.permute.xlu2 %894 }
 0x21d   : > { %v772_v62 = vpop.permute.xlu1 %771  ;;  %v731_v63 = vperm.slane %v725_v57, 2  ;;  %v730_v3 = vperm.slane %v725_v57, 1  ;;  %v785_v7 = vrot.slane %v784_v60, 1  ;;  %v729_v11 = vperm.slane %v725_v57, 0 }
 0x21e   : > { %v773_v8 = vrot.slane %v772_v62, 1  ;;  %v896_v0 = vrot.slane %v2509_v2, 7 }
 0x21f   : > { %736 = vrot.lane.b32.xlu0 %v731_v63, %s1905_s25  ;;  %734 = vrot.lane.b32.xlu1 %v730_v3, %s1905_s25  ;;  %v786_v16 = vsel %vm681_vm9, %v784_v60, %v785_v7 }
 0x220   : > { %v774_v13 = vsel %vm668_vm7, %v772_v62, %v773_v8  ;;  %732 = vrot.lane.b32.xlu2 %v729_v11, %s1905_s25  ;;  %v897_v43 = vsel %vm696_vm10, %v896_v0, %v2509_v2  ;;  %v1142_v0 = vstv %s2551_s22  ;;  %s1665_s25 = sshll.u32 %s1960_s19, 6  ;;  %s2693_s19 = sshll.u32 %s2040_s0, 6 }
 0x221   : > { %v776_v14 = vadd.f32 %v774_v13, %v764_v12  ;;  %v1041_v12 = vstv %s1559_s23  ;;  %s231_s23 = scalar_lea.vmem [#allocation10], %s2693_s19 }
 0x223   : > { %v788_v17 = vadd.f32 %v786_v16, %v776_v14  ;;  %v1043_v14 = vstv %s1608_s5  ;;  %v945_v16 = vstv %s1558_s7  ;;  %s1457_s5 = sshll.u32 %s231_s23, 4  ;;  %s1458_s5 = int_to_ptr.vmem [resolvable:$true] %s1457_s5 }
 0x224   : > { %v820_v18 = vpop.permute.xlu0 %819  ;;  %v2513_v19 = vpop.permute.xlu2 %969 }
 0x225   : > { %v808_v20 = vpop.permute.xlu1 %807  ;;  %v821_v9 = vrot.slane %v820_v18, 7  ;;  %v800_v10 = vadd.f32 %v798_v21, %v788_v17  ;;  %v1042_v17 = vmul.f32 %v1041_v12, %v2179_v50 }
 0x226   : > { %v809_v22 = vrot.slane %v808_v20, 7 }
 0x227   : > { %v822_v25 = vsel %vm722_vm12, %v821_v9, %v820_v18  ;;  %v947_v18 = vstv %s1607_s11  ;;  %v1044_v9 = vmul.f32 %v1043_v14, %v2183_v5 }
 0x228   : > { %v810_v23 = vsel %vm709_vm11, %v809_v22, %v808_v20  ;;  %v946_v22 = vmul.f32 %v945_v16, %v2179_v50 }
 0x229   : > { %v812_v24 = vadd.f32 %v810_v23, %v800_v10 }
 0x22b   : > { %v824_v26 = vadd.f32 %v822_v25, %v812_v24 }
 0x22c   : > { %v883_v58 = vpop.permute.xlu0 %882  ;;  %v2518_v27 = vpop.permute.xlu2 %983 }
 0x22d   : > { %v871_v28 = vpop.permute.xlu1 %870  ;;  %v830_v4 = vperm.slane %v824_v26, 2  ;;  %v829_v30 = vperm.slane %v824_v26, 1  ;;  %v828_v31 = vperm.slane %v824_v26, 0  ;;  %v884_v49 = vrot.slane %v883_v58, 1 }
 0x22e   : > { %v872_v38 = vrot.slane %v871_v28, 1  ;;  %v1045_v26 = vadd.f32 %v1044_v9, %v1042_v17 }
 0x22f   : > { %835 = vrot.lane.b32.xlu0 %v830_v4, %s1906_s10  ;;  %833 = vrot.lane.b32.xlu1 %v829_v30, %s1906_s10  ;;  %v885_v51 = vsel %vm681_vm9, %v883_v58, %v884_v49  ;;  %v948_v58 = vmul.f32 %v947_v18, %v2183_v5  ;;  %v1908_v18 = vmov 0  }
 0x230   : > { %831 = vrot.lane.b32.xlu2 %v828_v31, %s1906_s10  ;;  %v873_v44 = vsel %vm668_vm7, %v871_v28, %v872_v38  ;;  %v971_v31 = vrot.slane %v2513_v19, 1  ;;  %1745 = vset.pattern.permute.xlu0 %v1908_v18  ;;  %s1456_s10 = scalar_lea.hbm %s2672_s4, %s1665_s25 }
 0x231   : > { %v875_v6 = vadd.f32 %v873_v44, %v863_v47  ;;  %v949_v35 = vadd.f32 %v948_v58, %v946_v22  ;;  %v985_v44 = vrot.slane %v2518_v27, 7  ;;  %1744 = vset.pattern.permute.xlu1 %v1908_v18  ;;  %1743 = vset.pattern.permute.xlu2 %v1908_v18  ;;  %s1459_s7 = sshll.u32 %s1456_s10, 4  ;;  %s1460_s7 = int_to_ptr.hbm [resolvable:$true] %s1459_s7 }
 0x232   : > { %v972_v5 = vsel %vm668_vm7, %v2513_v19, %v971_v31  ;;  %s1835_s11 = sshra.s32 %s1460_s7, 4  ;;  %s1836_s11 = int_to_ptr.hbm [resolvable:$true] %s1835_s11 }
 0x233   : > { %v887_v1 = vadd.f32 %v885_v51, %v875_v6  ;;  %p1842_p0 = scmp.lt.s32.totalorder %s1836_s11, %s2672_s4 }
 0x234   : > { %v1054_v32 = vpop.permute.xlu0 %1053  ;;  %v2520_v33 = vpop.permute.xlu2 %1164 }
 0x235   : > { %v958_v34 = vpop.permute.xlu1 %957  ;;  %v899_v59 = vadd.f32 %v897_v43, %v887_v1  ;;  %v1055_v15 = vrot.slane %v1054_v32, 1 }
 0x236   : > { %v959_v20 = vrot.slane %v958_v34, 1 }
 0x237   : > { %v1056_v23 = vsel %vm655_vm8, %v1054_v32, %v1055_v15 }
 0x238   : > { %v960_v28 = vsel %vm655_vm8, %v958_v34, %v959_v20  ;;  %v1058_v29 = vadd.f32 %v1056_v23, %v1045_v26  ;;  %v1775_v26 = vld [vmem:[#allocation2] sm:$0x7] }
 0x239   : > { %v962_v36 = vadd.f32 %v960_v28, %v949_v35 }
 0x23b   : > { %v974_v6 = vadd.f32 %v972_v5, %v962_v36 }
 0x23c   : > { %v2528_v45 = vpop.permute.xlu0 %1152  ;;  %v919_v46 = vpop.permute.xlu2 %918 }
 0x23d   : > { %v1066_v48 = vpop.permute.xlu1 %1065  ;;  %v920_v55 = vrot.slane %v919_v46, 7  ;;  %v1154_v51 = vrot.slane %v2528_v45, 1 }
 0x23e   : > { %v1067_v21 = vrot.slane %v1066_v48, 1 }
 0x23f   : > { %v921_v62 = vsel %vm722_vm12, %v920_v55, %v919_v46  ;;  %v986_v55 = vsel %vm681_vm9, %v985_v44, %v2518_v27 }
 0x240   : > { %v1068_v4 = vsel %vm668_vm7, %v1066_v48, %v1067_v21  ;;  %v1241_v21 = vstv %s2567_s12 }
 0x241   : > { %v1070_v37 = vadd.f32 %v1068_v4, %v1058_v29 }
 0x244   : > { %v1078_v53 = vpop.permute.xlu0 %1077  ;;  %v2534_v56 = vpop.permute.xlu2 %1263 }
 0x245   : > { %v907_v54 = vpop.permute.xlu1 %906  ;;  %v1079_v24 = vrot.slane %v1078_v53, 7 }
 0x246   : > { %v908_v57 = vrot.slane %v907_v54, 7 }
 0x247   : > { %v1080_v32 = vsel %vm681_vm9, %v1079_v24, %v1078_v53  ;;  %v1141_v53 = vmul.f32 %v1140_v40, %v2179_v50  ;;  %v988_v50 = vadd.f32 %v986_v55, %v974_v6 }
 0x248   : > { %v909_v60 = vsel %vm709_vm11, %v908_v57, %v907_v54  ;;  %v1082_v34 = vadd.f32 %v1080_v32, %v1070_v37  ;;  %v1774_v57 = vld [vmem:[#allocation3] sm:$0x7]  ;;  %v1265_v37 = vrot.slane %v2534_v56, 1 }
 0x249   : > { %v911_v61 = vadd.f32 %v909_v60, %v899_v59  ;;  %v1143_v59 = vmul.f32 %v1774_v57, %v1142_v0  ;;  %v1242_v29 = vmul.f32 %v1774_v57, %v1241_v21 }
 0x24b   : > { %v923_v63 = vadd.f32 %v921_v62, %v911_v61  ;;  %v1155_v62 = vsel %vm655_vm8, %v2528_v45, %v1154_v51  ;;  %v1239_v45 = vstv %s2564_s29  ;;  %s1841_s29 = scalar_lea.hbm %s2672_s4, 128 }
 0x24c   : > { %v996_v3 = vpop.permute.xlu0 %995  ;;  %v2540_v13 = vpop.permute.xlu2 %1188  ;;  %v1240_v58 = vmul.f32 %v1775_v26, %v1239_v45 }
 0x24d   : > { %v2538_v7 = vpop.permute.xlu1 %1251  ;;  %v927_v8 = vperm.slane %v923_v63, 0  ;;  %v929_v2 = vperm.slane %v923_v63, 2  ;;  %v928_v11 = vperm.slane %v923_v63, 1  ;;  %v997_v46 = vrot.slane %v996_v3, 7 }
 0x24e   : > { %v1253_v23 = vrot.slane %v2538_v7, 1  ;;  %v1190_v4 = vrot.slane %v2540_v13, 7 }
 0x24f   : > { %930 = vrot.lane.b32.xlu0 %v927_v8, %s1907_s14  ;;  %934 = vrot.lane.b32.xlu1 %v929_v2, %s1907_s14  ;;  %v998_v60 = vsel %vm696_vm10, %v997_v46, %v996_v3  ;;  %v1166_v8 = vrot.slane %v2520_v33, 1  ;;  %v1144_v2 = vadd.f32 %v1143_v59, %v1141_v53 }
 0x250   : > { %932 = vrot.lane.b32.xlu2 %v928_v11, %s1907_s14  ;;  %v1000_v12 = vadd.f32 %v998_v60, %v988_v50  ;;  %v1254_v36 = vsel %vm655_vm8, %v2538_v7, %v1253_v23  ;;  %v1191_v5 = vsel %vm696_vm10, %v1190_v4, %v2540_v13  ;;  %vm1131_vm8 = vcmask 384000   ;;  %s1837_s14 = scalar_lea.hbm %s1836_s11, 64 }
 0x251   : > { %v1157_v3 = vadd.f32 %v1155_v62, %v1144_v2  ;;  %v1167_v22 = vsel %vm668_vm7, %v2520_v33, %v1166_v8  ;;  %p1838_p4 = scmp.ne.s32.totalorder %s1836_s11, %s1837_s14  ;;  %p1843_p3 = scmp.lt.s32.totalorder %s1841_s29, %s1837_s14 }
 0x253   : > { %v1169_v28 = vadd.f32 %v1167_v22, %v1157_v3  ;;  %v1390_v3 = vld [vmem:[#allocation4] sm:$0xff]  ;;  %p1839_p6 = pnand %p1838_p4, %p1991_p11  ;;  %p1844_p5 = por %p1843_p3, %p1842_p0 }
 0x254   : > { %v2547_v10 = vpop.permute.xlu0 %1176  ;;  %v1114_v38 = vpop.permute.xlu2 %1113 }
 0x255   : > { %v1090_v25 = vpop.permute.xlu1 %1089  ;;  %v1115_v47 = vrot.slane %v1114_v38, 7  ;;  %v1178_v27 = vrot.slane %v2547_v10, 7  ;;  %p1840_p13 = pneg %p1839_p6 }
 0x256   : > { %v1091_v30 = vrot.slane %v1090_v25, 7 }
 0x257   : > { %v1116_v61 = vsel %vm722_vm12, %v1115_v47, %v1114_v38  ;;  %v1179_v24 = vsel %vm681_vm9, %v1178_v27, %v2547_v10  ;;  %v1243_v38 = vadd.f32 %v1242_v29, %v1240_v58  ;;  %v339_v58 = vand.u32 127, %v338_v52  ;;  %p1845_p8 = pnand %p1844_p5, %p1840_p13 }
 0x258   : > { %v1092_v39 = vsel %vm696_vm10, %v1091_v30, %v1090_v25  ;;  %v1181_v35 = vadd.f32 %v1179_v24, %v1169_v28 }
 0x259   : > { %v1094_v1 = vadd.f32 %v1092_v39, %v1082_v34  ;;  %v1256_v44 = vadd.f32 %v1254_v36, %v1243_v38  ;;  %v345_v4 = vand.u32 15, %v339_v58 }
 0x25a   : > { %v1193_v7 = vadd.f32 %v1191_v5, %v1181_v35 }
 0x25b   : > { %vm825_vm0 = vcmp.ge.s32.totalorder %v345_v4, 2  ;;  %vm726_vm1 = vcmp.ge.s32.totalorder %v345_v4, 3  ;;  %vm924_vm2 = vcmp.ge.s32.totalorder %v345_v4, 1 }
 0x25c   : > { %v1102_v42 = vpop.permute.xlu0 %1101  ;;  %v1213_v32 = vpop.permute.xlu2 %1212 }
 0x25d   : > { %v1103_v48 = vrot.slane %v1102_v42, 7  ;;  %v1008_v49 = vpop.permute.xlu1 %1007  ;;  %v1214_v40 = vrot.slane %v1213_v32, 7 }
 0x25e   : > { %v1009_v54 = vrot.slane %v1008_v49, 7 }
 0x25f   : > { %v1104_v19 = vsel %vm709_vm11, %v1103_v48, %v1102_v42  ;;  %v1266_v48 = vsel %vm668_vm7, %v2534_v56, %v1265_v37  ;;  %v1215_v6 = vsel %vm722_vm12, %v1214_v40, %v1213_v32 }
 0x260   : > { %v1106_v43 = vadd.f32 %v1104_v19, %v1094_v1  ;;  %v1010_v11 = vsel %vm709_vm11, %v1009_v54, %v1008_v49  ;;  %v1268_v1 = vadd.f32 %v1266_v48, %v1256_v44 }
 0x261   : > { %v1012_v20 = vadd.f32 %v1010_v11, %v1000_v12 }
 0x262   : > { %v1118_v63 = vadd.f32 %v1116_v61, %v1106_v43 }
 0x264   : > { %v1020_v14 = vpop.permute.xlu0 %1019  ;;  %v1123_v15 = vperm.slane %v1118_v63, 1  ;;  %v1122_v10 = vperm.slane %v1118_v63, 0  ;;  %v1124_v13 = vperm.slane %v1118_v63, 2 }
 0x265   : > { %v1021_v16 = vrot.slane %v1020_v14, 7  ;;  %v1276_v17 = vpop.permute.xlu1 %1275 }
 0x266   : > { %1127 = vrot.lane.b32.xlu0 %v1123_v15, %s1909_s30  ;;  %v1277_v34 = vrot.slane %v1276_v17, 7  ;;  %v1391_v15 = vld [vmem:[#allocation4 + $0x8] sm:$0xff] }
 0x267   : > { %v1022_v9 = vsel %vm722_vm12, %v1021_v16, %v1020_v14  ;;  %v1392_v14 = vld [vmem:[#allocation4 + $0x10] sm:$0xff]  ;;  %v1393_v16 = vld [vmem:[#allocation4 + $0x18] sm:$0xff] }
 0x268   : > { %v1024_v25 = vadd.f32 %v1022_v9, %v1012_v20  ;;  %v1278_v0 = vsel %vm681_vm9, %v1277_v34, %v1276_v17  ;;  %vm1230_vm9 = vcmask 375808  }
 0x269   : > { %v1280_v43 = vadd.f32 %v1278_v0, %v1268_v1 }
 0x26a   : > { %v1028_v30 = vperm.slane %v1024_v25, 2  ;;  %v1027_v31 = vperm.slane %v1024_v25, 1  ;;  %v1026_v51 = vperm.slane %v1024_v25, 0 }
 0x26c   : > { %v1288_v33 = vpop.permute.xlu0 %1287  ;;  %1033 = vrot.lane.b32.xlu1 %v1028_v30, %s2690_s26  ;;  %1031 = vrot.lane.b32.xlu2 %v1027_v31, %s2690_s26  ;;  %v340_v31 = vadd.s32 128, %v339_v58 }
 0x26d   : > { %v1201_v39 = vpop.permute.xlu1 %1200  ;;  %v1289_v46 = vrot.slane %v1288_v33, 7 }
 0x26e   : > { %v1202_v42 = vrot.slane %v1201_v39, 7  ;;  %1125 = vrot.lane.b32.xlu0 %v1122_v10, %s1909_s30  ;;  %v352_v10 = vand.u32 15, %v340_v31 }
 0x26f   : > { %v1290_v19 = vsel %vm696_vm10, %v1289_v46, %v1288_v33  ;;  %vm1119_vm10 = vcmp.lt.s32.totalorder %v345_v4, 15 }
 0x270   : > { %v1203_v47 = vsel %vm709_vm11, %v1202_v42, %v1201_v39  ;;  %v1292_v60 = vadd.f32 %v1290_v19, %v1280_v43  ;;  %vm826_vm3 = vcmp.ge.s32.totalorder %v352_v10, 2  ;;  %vm727_vm4 = vcmp.ge.s32.totalorder %v352_v10, 3 }
 0x271   : > { %v1205_v49 = vadd.f32 %v1203_v47, %v1193_v7  ;;  %vm925_vm7 = vcmp.ge.s32.totalorder %v352_v10, 1 }
 0x273   : > { %v1217_v53 = vadd.f32 %v1215_v6, %v1205_v49 }
 0x274   : > { %v1312_v54 = vpop.permute.xlu0 %1311  ;;  %1029 = vrot.lane.b32.xlu1 %v1026_v51, %s2690_s26  ;;  %1129 = vrot.lane.b32.xlu2 %v1124_v13, %s1909_s30  ;;  %s1911_s26 = smov 45  }
 0x275   : > { %v1300_v55 = vpop.permute.xlu1 %1299  ;;  %v1221_v57 = vperm.slane %v1217_v53, 0  ;;  %v1313_v56 = vrot.slane %v1312_v54, 7  ;;  %v1223_v63 = vperm.slane %v1217_v53, 2  ;;  %v1222_v8 = vperm.slane %v1217_v53, 1 }
 0x276   : > { %v1301_v59 = vrot.slane %v1300_v55, 7 }
 0x277   : > { %1224 = vrot.lane.b32.xlu0 %v1221_v57, %s1910_s20  ;;  %v1314_v50 = vsel %vm722_vm12, %v1313_v56, %v1312_v54  ;;  %vm1218_vm12 = vcmp.lt.s32.totalorder %v345_v4, 14 }
 0x278   : > { %v1302_v61 = vsel %vm709_vm11, %v1301_v59, %v1300_v55 }
 0x279   : > { %v1304_v62 = vadd.f32 %v1302_v61, %v1292_v60 }
 0x27a   : > { %v733_v17 = vpop.permute.xlu2 %732 }
 0x27b   : > { %v1316_v2 = vadd.f32 %v1314_v50, %v1304_v62 }
 0x27c   : > { %1228 = vrot.lane.b32.xlu1 %v1223_v63, %s1910_s20  ;;  %1226 = vrot.lane.b32.xlu2 %v1222_v8, %s1910_s20 }
 0x27d   : > { %v1320_v11 = vperm.slane %v1316_v2, 0  ;;  %v1322_v12 = vperm.slane %v1316_v2, 2  ;;  %v1321_v27 = vperm.slane %v1316_v2, 1 }
 0x27f   : > { %1323 = vrot.lane.b32.xlu0 %v1320_v11, %s1911_s26 }
 0x284   : > { %1327 = vrot.lane.b32.xlu1 %v1322_v12, %s1911_s26  ;;  %1325 = vrot.lane.b32.xlu2 %v1321_v27, %s1911_s26 }
 0x287   : > { %1407 = vperm.xlu0 %1745, %v1392_v14  }
 0x28a   : > { %v832_v45 = vpop.permute.xlu2 %831 }
 0x28c   : > { %1402 = vperm.xlu1 %1744, %v1391_v15   ;;  %1397 = vperm.xlu2 %1743, %v1390_v3  }
 0x291   : > { %v737_v18 = vpop.permute.xlu0 %736  ;;  %v735_v20 = vpop.permute.xlu1 %734 }
 0x292   : > { %v739_v32 = vsel %vm738_vm14, %v733_v17, %v735_v20  ;;  %v740_v42 = vsel %vm738_vm14, %v735_v20, %v737_v18  ;;  %vm1120_vm14 = vcmp.lt.s32.totalorder %v352_v10, 15 }
 0x293   : > { %v743_v52 = vsel %vm726_vm1, %v739_v32, 0.0  ;;  %v744_v6 = vsel %vm727_vm4, %v740_v42, 0.0  ;;  %v1382_v42 = vld [vmem:[%s2046_s8] sm:$0xff] }
 0x294   : > { %1412 = vperm.xlu2 %1743, %v1393_v16  }
 0x2a1   : > { %v836_v21 = vpop.permute.xlu0 %835  ;;  %v834_v22 = vpop.permute.xlu1 %833 }
 0x2a2   : > { %v838_v29 = vsel %vm837_vm13, %v832_v45, %v834_v22  ;;  %v839_v5 = vsel %vm837_vm13, %v834_v22, %v836_v21  ;;  %vm1329_vm13 = vcmask 367616  }
 0x2a3   : > { %v842_v33 = vsel %vm825_vm0, %v838_v29, 0.0  ;;  %v843_v47 = vsel %vm826_vm3, %v839_v5, 0.0  ;;  %vm1219_vm0 = vcmp.lt.s32.totalorder %v352_v10, 14 }
 0x2a4   : > { %v844_v38 = vadd.f32 %v842_v33, %v743_v52  ;;  %v845_v13 = vadd.f32 %v843_v47, %v744_v6  ;;  %v1387_v47 = vld [vmem:[%s2046_s8 + $0x28] sm:$0xff] }
 0x2aa   : > { %v933_v9 = vpop.permute.xlu2 %932 }
 0x2c1   : > { %v931_v23 = vpop.permute.xlu0 %930  ;;  %v935_v25 = vpop.permute.xlu1 %934 }
 0x2c2   : > { %v937_v36 = vsel %vm936_vm15, %v931_v23, %v933_v9  ;;  %v938_v7 = vsel %vm936_vm15, %v933_v9, %v935_v25  ;;  %vm1317_vm15 = vcmp.lt.s32.totalorder %v345_v4, 13 }
 0x2c3   : > { %v941_v37 = vsel %vm924_vm2, %v937_v36, 0.0  ;;  %v942_v0 = vsel %vm925_vm7, %v938_v7, 0.0  ;;  %v1386_v7 = vld [vmem:[%s2046_s8 + $0x20] sm:$0xff] }
 0x2c4   : > { %v943_v44 = vadd.f32 %v941_v37, %v844_v38  ;;  %v944_v43 = vadd.f32 %v942_v0, %v845_v13  ;;  %v1389_v13 = vld [vmem:[%s2046_s8 + $0x38] sm:$0xff] }
 0x2c6   : > { %v1032_v24 = vpop.permute.xlu2 %1031 }
 0x2ce   : > { %v1130_v28 = vpop.permute.xlu2 %1129 }
 0x2d6   : > { %v1227_v40 = vpop.permute.xlu2 %1226 }
 0x2d8   : > { %v1128_v26 = vpop.permute.xlu0 %1127 }
 0x2d9   : > { %v1133_v57 = vsel %vm1131_vm8, %v1128_v26, %v1130_v28 }
 0x2da   : > { %v1137_v8 = vsel %vm1120_vm14, %v1133_v57, 0.0 }
 0x2de   : > { %v1034_v30 = vpop.permute.xlu1 %1033  ;;  %v1326_v59 = vpop.permute.xlu2 %1325 }
 0x2df   : > { %v1036_v53 = vsel %vm709_vm11, %v1032_v24, %v1034_v30 }
 0x2e0   : > { %v1126_v35 = vpop.permute.xlu0 %1125  ;;  %v1040_v56 = vadd.f32 %v1036_v53, %v944_v43 }
 0x2e1   : > { %v1132_v48 = vsel %vm1131_vm8, %v1126_v35, %v1128_v26 }
 0x2e2   : > { %v1136_v1 = vsel %vm1119_vm10, %v1132_v48, 0.0  ;;  %v1139_v12 = vadd.f32 %v1137_v8, %v1040_v56 }
 0x2e6   : > { %v1030_v39 = vpop.permute.xlu1 %1029 }
 0x2e7   : > { %v1035_v34 = vsel %vm709_vm11, %v1030_v39, %v1032_v24  ;;  %vm1318_vm11 = vcmp.lt.s32.totalorder %v352_v10, 13  ;;  %v1398_v39 = vpop.permute.xlu2 %1397 }
 0x2e8   : > { %v1039_v49 = vadd.f32 %v1035_v34, %v943_v44  ;;  %v1383_v44 = vld [vmem:[%s2046_s8 + $0x8] sm:$0xff]  ;;  %v1415_v48 = vmul.f32 %v1398_v39, %v1382_v42 }
 0x2e9   : > { %v1225_v46 = vpop.permute.xlu0 %1224 }
 0x2ea   : > { %v1231_v51 = vsel %vm1230_vm9, %v1225_v46, %v1227_v40  ;;  %v1138_v19 = vadd.f32 %v1136_v1, %v1039_v49  ;;  %v1388_v49 = vld [vmem:[%s2046_s8 + $0x30] sm:$0xff] }
 0x2eb   : > { %v1235_v55 = vsel %vm1218_vm12, %v1231_v51, 0.0  ;;  %v1416_v51 = vmul.f32 %v1398_v39, %v1383_v44 }
 0x2ec   : > { %v1237_v62 = vadd.f32 %v1235_v55, %v1138_v19 }
 0x2ee   : > { %v1229_v54 = vpop.permute.xlu1 %1228 }
 0x2ef   : > { %v1232_v60 = vsel %vm1230_vm9, %v1227_v40, %v1229_v54  ;;  %v1413_v6 = vpop.permute.xlu2 %1412  ;;  %v1384_v54 = vld [vmem:[%s2046_s8 + $0x10] sm:$0xff] }
 0x2f0   : > { %v1236_v2 = vsel %vm1219_vm0, %v1232_v60, 0.0  ;;  %v1421_v55 = vmul.f32 %v1413_v6, %v1388_v49  ;;  %v1385_v60 = vld [vmem:[%s2046_s8 + $0x18] sm:$0xff]  ;;  %s1445_s8 = scalar_lea.sflag [#allocation7], %s2040_s0 }
 0x2f1   : > { %v1324_v61 = vpop.permute.xlu0 %1323  ;;  %v1238_v15 = vadd.f32 %v1236_v2, %v1139_v12 }
 0x2f2   : > { %v1330_v50 = vsel %vm1329_vm13, %v1324_v61, %v1326_v59  ;;  %v1422_v61 = vmul.f32 %v1413_v6, %v1389_v13 }
 0x2f3   : > { %v1334_v63 = vsel %vm1317_vm15, %v1330_v50, 0.0 }
 0x2f4   : > { %v1336_v11 = vadd.f32 %v1334_v63, %v1237_v62 }
 0x2f6   : > { %v1657_v27 = vmul.f32 -1.442695, %v1336_v11  ;;  %v1328_v14 = vpop.permute.xlu1 %1327 }
 0x2f7   : > { %v1331_v3 = vsel %vm1329_vm13, %v1326_v59, %v1328_v14 }
 0x2f8   : > { %1766 = vpow2.f32 %v1657_v27  ;;  %v1335_v16 = vsel %vm1318_vm11, %v1331_v3, 0.0 }
 0x2f9   : > { %v1337_v17 = vadd.f32 %v1335_v16, %v1238_v15  ;;  %v1408_v46 = vpop.permute.xlu0 %1407 }
 0x2fa   : > { %v1419_v1 = vmul.f32 %v1408_v46, %v1386_v7  ;;  %v1420_v41 = vmul.f32 %v1408_v46, %v1387_v47 }
 0x2fb   : > { %v1658_v18 = vmul.f32 -1.442695, %v1337_v17 }
 0x2fd   : > { %1768 = vpow2.f32 %v1658_v18 }
 0x2fe   : > { %v1767_v45 = vpop.eup %1766  ;;  %v1403_v43 = vpop.permute.xlu1 %1402 }
 0x2ff   : > { %v1344_v20 = vadd.f32 1.0, %v1767_v45  ;;  %v1417_v63 = vmul.f32 %v1403_v43, %v1384_v54  ;;  %v1418_v2 = vmul.f32 %v1403_v43, %v1385_v60 }
 0x301   : > { %1770 = vrcp.f32 %v1344_v20  ;;  %vm1351_vm3 = vweird.f32 %v1344_v20  ;;  %v1357_v35 = vand.u32 2147483648, %v1344_v20  ;;  %v1355_v32 = vand.u32 2147483647, %v1344_v20 }
 0x303   : > { %v1769_v21 = vpop.eup %1768  ;;  %v1358_v37 = vor.u32 1.1754944e-38, %v1357_v35  ;;  %vm1356_vm10 = vcmp.eq.f32.partialorder %v1355_v32, 8.507059e+37 }
 0x304   : > { %v1345_v9 = vadd.f32 1.0, %v1769_v21 }
 0x306   : > { %1772 = vrcp.f32 %v1345_v9  ;;  %v1372_v4 = vand.u32 2147483648, %v1345_v9  ;;  %v1370_v29 = vand.u32 2147483647, %v1345_v9  ;;  %vm1366_vm7 = vweird.f32 %v1345_v9 }
 0x307   : > { %v1771_v22 = vpop.eup %1770 }
 0x308   : > { %v1347_v23 = vmul.f32 %v1771_v22, %v1344_v20  ;;  %vm1352_vm1 = vweird.f32 %v1771_v22  ;;  %v1373_v33 = vor.u32 1.1754944e-38, %v1372_v4  ;;  %vm1371_vm9 = vcmp.eq.f32.partialorder %v1370_v29, 8.507059e+37 }
 0x309   : > { %vm1353_vm4 = vmor %vm1351_vm3, %vm1352_vm1 }
 0x30a   : > { %v1348_v24 = vsub.f32 1.0, %v1347_v23 }
 0x30c   : > { %v1773_v25 = vpop.eup %1772  ;;  %v1349_v26 = vmul.f32 %v1771_v22, %v1348_v24 }
 0x30d   : > { %v1362_v58 = vmul.f32 %v1773_v25, %v1345_v9  ;;  %vm1367_vm2 = vweird.f32 %v1773_v25 }
 0x30e   : > { %v1350_v30 = vadd.f32 %v1771_v22, %v1349_v26  ;;  %vm1368_vm8 = vmor %vm1366_vm7, %vm1367_vm2 }
 0x30f   : > { %v1363_v28 = vsub.f32 1.0, %v1362_v58 }
 0x310   : > { %v1354_v10 = vsel %vm1353_vm4, %v1771_v22, %v1350_v30 }
 0x311   : > { %v1364_v31 = vmul.f32 %v1773_v25, %v1363_v28  ;;  %v1359_v40 = vsel %vm1356_vm10, %v1358_v37, %v1354_v10 }
 0x313   : > { %v1365_v36 = vadd.f32 %v1773_v25, %v1364_v31 }
 0x315   : > { %v1369_v52 = vsel %vm1368_vm8, %v1773_v25, %v1365_v36 }
 0x316   : > { %v1374_v38 = vsel %vm1371_vm9, %v1373_v33, %v1369_v52 }
 0x317   : > { %v1378_v5 = vrot.slane %v1374_v38, 7 }
 0x319   : > { %v1379_v34 = vsel %vm608_vm5, %v1359_v40, %v1378_v5 }
 0x31a   : > { %1381 = vst.msk [vmem:[#allocation2 + $0x1] sm:$0x3] %vm2157_vm6, %v1379_v34 }
 0x321   : > { %v1394_v0 = vld [vmem:[#allocation2 + $0x1] sm:$0x3] }
 0x322   : > { %v1424_v53 = vperm.slane %v1394_v0, 0  ;;  %v1425_v19 = vperm.slane %v1394_v0, 1 }
 0x324   : > { %v1428_v57 = vmul.f32 %v1424_v53, %v1415_v48  ;;  %v1429_v56 = vmul.f32 %v1425_v19, %v1416_v51  ;;  %v1432_v59 = vmul.f32 %v1424_v53, %v1419_v1  ;;  %v1433_v62 = vmul.f32 %v1425_v19, %v1420_v41 }
 0x325   : > { %v1434_v50 = vmul.f32 %v1424_v53, %v1421_v55  ;;  %v1435_v8 = vmul.f32 %v1425_v19, %v1422_v61  ;;  %v1430_v11 = vmul.f32 %v1424_v53, %v1417_v63  ;;  %v1431_v12 = vmul.f32 %v1425_v19, %v1418_v2 }
 0x326   : > { %1436 = vst [vmem:[%s231_s23] sm:$0xff] %v1428_v57 }
 0x327   : > { %1437 = vst [vmem:[%s231_s23 + $0x8] sm:$0xff] %v1429_v56 }
 0x328   : > { %1440 = vst [vmem:[%s231_s23 + $0x20] sm:$0xff] %v1432_v59 }
 0x329   : > { %1441 = vst [vmem:[%s231_s23 + $0x28] sm:$0xff] %v1433_v62 }
 0x32a   : > { %1442 = vst [vmem:[%s231_s23 + $0x30] sm:$0xff] %v1434_v50 }
 0x32b   : > { %1443 = vst [vmem:[%s231_s23 + $0x38] sm:$0xff] %v1435_v8 }
 0x32c   : > { %1438 = vst [vmem:[%s231_s23 + $0x10] sm:$0xff] %v1430_v11 }
 0x32d   : > { %1439 = vst [vmem:[%s231_s23 + $0x18] sm:$0xff] %v1431_v12 }
 0x32e   : > { %1848 = shalt.err (!%p1845_p8)
}
 0x32f   : > { %s1912_s0 = smov 256   ;;  %s1913_s20 = smov 16  }
 0x330   : > { %1672 = dma.vmem_to_hbm [thread:$0]  (%p1991_p11), %s1458_s5, 1024, %s1460_s7, %s1445_s8, %s1912_s0, %s1912_s0, %s1913_s20  }
 0x331 PF: > { %s1474_s26 = sand.u32 1, %s1879_s15   ;;  %p2694_p9 = scmp.ge.s32.totalorder %s1891_s18, 2 }
 0x332   : > { %s1475_s25 = scalar_lea.sflag [#allocation7], %s1474_s26 }
 0x333   : > { %p1683_p10 = pnand %p2694_p9, %p1995_p12 }
 0x335   : > { %p1684_p1 = pneg %p1683_p10 }
 0x337   : > { %1874 = dma.done.wait (%p1684_p1), %s1475_s25, 1024  }
 0x338   : > { %1876 = vsyncadd (%p1684_p1), %s1475_s25, 4294966272  ;;  %p18_p2 = scmp.ge.s32.totalorder %s1964_s21, 4   ;;  %s2695_s15 = smov %s1883_s16 }
 0x339   : > { %s2696_s16 = smov %s1887_s17  ;;  %s2697_s17 = smov %s1976_s24 }
 0x33a   : > { %s2698_s18 = smov %s1964_s21  ;;  %20 = sbr.rel (!%p18_p2) target bundleno = 8 (0x8), region = 86 }
 0x33f   :  { %1481 = vsyncpa [#allocation6], 1 }
 0x340   :  { %1483 = vsyncpa [#allocation6 + $0x1], 1 }
 0x341   :  { %1484 = vsyncpa [#allocation7], 1 }
 0x342   :  { %1486 = vsyncpa [#allocation7 + $0x1], 1 }
 0x343   :  { %1487 = vsyncpa [#allocation8], 1 }
 0x344   :  { %1489 = vsyncpa [#allocation8 + $0x1], 1 }

</bundles_post_ra>
